<compile_context>
chip_gen: v5e
topology: v5e:2x2
jax: 0.10.0
libtpu: 0.0.40
codegen_flags: <defaults>
</compile_context>

<pallas_src>
import jax
import jax.numpy as jnp
from jax.experimental import pallas as pl
from jax.experimental.pallas import tpu as pltpu

LANE = 128


def mlp_v0_kernel(x_ref, w1_ref, b1_ref, w2_ref, b2_ref, out_ref):
    """Fused 2-layer linear stack (no activations):  (x @ w1 + b1) @ w2 + b2.

    x_ref : (TB, D)   compute dtype (bf16 or f32)
    w1_ref: (D, Hp)   compute dtype
    b1_ref: (1, Hp)   f32
    w2_ref: (Hp, Op)  f32
    b2_ref: (1, Op)   f32
    out_ref: (TB, Op) f32  (lane-dense: Op is a multiple of 128)
    """
    h = jnp.dot(x_ref[...], w1_ref[...],
                preferred_element_type=jnp.float32) + b1_ref[...]
    o = jnp.dot(h, w2_ref[...],
                preferred_element_type=jnp.float32) + b2_ref[...]
    out_ref[...] = o.astype(out_ref.dtype)


def _round_up(n, m):
    return ((n + m - 1) // m) * m


def fashion_mnist_model_v0(x_nchw, w1, b1, w2, b2, *,
                           compute_dtype=jnp.bfloat16, tb=256):
    """Forward pass of FashionMNISTModelV0.

    x_nchw: (B, C, H, W) float32 -- flattened to (B, C*H*W) before the kernel.
    w1: (D, hidden), b1: (hidden,), w2: (hidden, out), b2: (out,)
    Returns: (B, out) float32
    """
    B = x_nchw.shape[0]
    x = x_nchw.reshape(B, -1).astype(jnp.float32)     # nn.Flatten()
    D = x.shape[1]
    H = w1.shape[1]
    O = w2.shape[1]

    # Lane-dense padding of hidden / output feature dims, batch padded to TB.
    Hp = _round_up(max(H, LANE), LANE)
    Op = _round_up(max(O, LANE), LANE)
    TB = tb
    Bp = _round_up(max(B, TB), TB)

    x_p = jnp.pad(x, ((0, Bp - B), (0, 0))).astype(compute_dtype)
    w1_p = jnp.pad(w1, ((0, 0), (0, Hp - H))).astype(compute_dtype)
    b1_p = jnp.pad(b1, (0, Hp - H)).reshape(1, Hp).astype(jnp.float32)
    w2_p = jnp.pad(w2, ((0, Hp - H), (0, Op - O))).astype(jnp.float32)
    b2_p = jnp.pad(b2, (0, Op - O)).reshape(1, Op).astype(jnp.float32)

    grid = (Bp // TB,)

    out_padded = pl.pallas_call(
        mlp_v0_kernel,
        out_shape=jax.ShapeDtypeStruct((Bp, Op), jnp.float32),
        grid_spec=pl.GridSpec(
            grid=grid,
            in_specs=[
                pl.BlockSpec((TB, D), lambda i: (i, 0)),   # x: tiled over batch
                pl.BlockSpec((D, Hp), lambda i: (0, 0)),   # w1: resident
                pl.BlockSpec((1, Hp), lambda i: (0, 0)),   # b1: resident
                pl.BlockSpec((Hp, Op), lambda i: (0, 0)),  # w2: resident
                pl.BlockSpec((1, Op), lambda i: (0, 0)),   # b2: resident
            ],
            out_specs=pl.BlockSpec((TB, Op), lambda i: (i, 0)),
        ),
        compiler_params=pltpu.CompilerParams(
            # Batch tiles are independent -> shard across TCs on v7x megacore.
            dimension_semantics=("parallel",),
        ),
    )(x_p, w1_p, b1_p, w2_p, b2_p)

    return out_padded[:B, :O]


def _reference(x_nchw, w1, b1, w2, b2):
    x = x_nchw.reshape(x_nchw.shape[0], -1)
    h = x @ w1 + b1          # no activation (V0)
    return h @ w2 + b2       # no activation (V0)


if __name__ == "__main__":
    # FashionMNIST-like small config: batch=8, 1x28x28 images -> D=784,
    # hidden_units=32, output_shape=10.
    B, C, Himg, Wimg = 8, 1, 28, 28
    D = C * Himg * Wimg
    HIDDEN = 32
    OUT = 10

    key = jax.random.PRNGKey(0)
    kx, kw1, kb1, kw2, kb2 = jax.random.split(key, 5)

    x = jax.random.normal(kx, (B, C, Himg, Wimg), dtype=jnp.float32)

    # Deterministic parameter init (uniform, like torch's default Linear init scale).
    lim1 = 1.0 / (D ** 0.5)
    lim2 = 1.0 / (HIDDEN ** 0.5)
    w1 = jax.random.uniform(kw1, (D, HIDDEN), jnp.float32, -lim1, lim1)
    b1 = jax.random.uniform(kb1, (HIDDEN,), jnp.float32, -lim1, lim1)
    w2 = jax.random.uniform(kw2, (HIDDEN, OUT), jnp.float32, -lim2, lim2)
    b2 = jax.random.uniform(kb2, (OUT,), jnp.float32, -lim2, lim2)

    ref = _reference(x, w1, b1, w2, b2)

    # bf16-input path (default, applies the HBM-bandwidth feedback).
    out_bf16 = fashion_mnist_model_v0(x, w1, b1, w2, b2,
                                      compute_dtype=jnp.bfloat16)
    out_bf16 = jax.block_until_ready(out_bf16)
    assert out_bf16.shape == (B, OUT), out_bf16.shape
    assert jnp.allclose(out_bf16, ref, atol=3e-2, rtol=3e-2), \
        "bf16 kernel mismatch vs reference"

    # f32-input path (tighter numerical check of the same kernel structure).
    out_f32 = fashion_mnist_model_v0(x, w1, b1, w2, b2,
                                     compute_dtype=jnp.float32)
    out_f32 = jax.block_until_ready(out_f32)
    assert out_f32.shape == (B, OUT), out_f32.shape
    assert jnp.allclose(out_f32, ref, atol=2e-2, rtol=2e-2), \
        "f32 kernel mismatch vs reference"

    print("KERNEL_OK")
</pallas_src>

<mosaic_0001>
module attributes {stable_mosaic.version = 11 : i64} {
  func.func @mlp_v0_kernel(%arg0: i32, %arg1: memref<256x784xbf16, #tpu.memory_space<vmem>>, %arg2: memref<784x128xbf16, #tpu.memory_space<vmem>>, %arg3: memref<1x128xf32, #tpu.memory_space<vmem>>, %arg4: memref<128x128xf32, #tpu.memory_space<vmem>>, %arg5: memref<1x128xf32, #tpu.memory_space<vmem>>, %arg6: memref<256x128xf32, #tpu.memory_space<vmem>>) attributes {dimension_semantics = [#tpu.dimension_semantics<parallel>], iteration_bounds = array<i64: 1>, scalar_prefetch = 0 : i64, scratch_operands = 0 : i64, tpu.core_type = #tpu.core_type<tc>, window_params = [{transform_indices = @transform_0, window_bounds = array<i64: 256, 784>}, {pipeline_mode = #tpu.pipeline_mode<synchronous>, transform_indices = @transform_1, window_bounds = array<i64: 784, 128>}, {pipeline_mode = #tpu.pipeline_mode<synchronous>, transform_indices = @transform_2, window_bounds = array<i64: 1, 128>}, {pipeline_mode = #tpu.pipeline_mode<synchronous>, transform_indices = @transform_3, window_bounds = array<i64: 128, 128>}, {pipeline_mode = #tpu.pipeline_mode<synchronous>, transform_indices = @transform_4, window_bounds = array<i64: 1, 128>}, {transform_indices = @transform_5, window_bounds = array<i64: 256, 128>}]} {
    %c0 = arith.constant 0 : index
    %c0_0 = arith.constant 0 : index
    %0 = vector.load %arg1[%c0, %c0_0] : memref<256x784xbf16, #tpu.memory_space<vmem>>, vector<256x784xbf16>
    %c0_1 = arith.constant 0 : index
    %c0_2 = arith.constant 0 : index
    %1 = vector.load %arg2[%c0_1, %c0_2] : memref<784x128xbf16, #tpu.memory_space<vmem>>, vector<784x128xbf16>
    %cst = arith.constant dense<0.000000e+00> : vector<256x128xf32>
    %2 = tpu.matmul %0, %1, %cst {dimension_numbers = #tpu.dot_dimension_numbers<[1], [0], [0], [1], [0, 0, 1, 1], [], []>} : vector<256x784xbf16>, vector<784x128xbf16>, vector<256x128xf32> -> vector<256x128xf32>
    %c0_3 = arith.constant 0 : index
    %c0_4 = arith.constant 0 : index
    %3 = vector.load %arg3[%c0_3, %c0_4] : memref<1x128xf32, #tpu.memory_space<vmem>>, vector<1x128xf32>
    %4 = vector.broadcast %3 : vector<1x128xf32> to vector<256x128xf32>
    %5 = arith.addf %2, %4 : vector<256x128xf32>
    %c0_5 = arith.constant 0 : index
    %c0_6 = arith.constant 0 : index
    %6 = vector.load %arg4[%c0_5, %c0_6] : memref<128x128xf32, #tpu.memory_space<vmem>>, vector<128x128xf32>
    %cst_7 = arith.constant dense<0.000000e+00> : vector<256x128xf32>
    %7 = tpu.matmul %5, %6, %cst_7 {dimension_numbers = #tpu.dot_dimension_numbers<[1], [0], [0], [1], [0, 0, 1, 1], [], []>} : vector<256x128xf32>, vector<128x128xf32>, vector<256x128xf32> -> vector<256x128xf32>
    %c0_8 = arith.constant 0 : index
    %c0_9 = arith.constant 0 : index
    %8 = vector.load %arg5[%c0_8, %c0_9] : memref<1x128xf32, #tpu.memory_space<vmem>>, vector<1x128xf32>
    %9 = vector.broadcast %8 : vector<1x128xf32> to vector<256x128xf32>
    %10 = arith.addf %7, %9 : vector<256x128xf32>
    %c0_10 = arith.constant 0 : index
    %c0_11 = arith.constant 0 : index
    %11 = vector.load %arg6[%c0_10, %c0_11] : memref<256x128xf32, #tpu.memory_space<vmem>>, vector<256x128xf32>
    tpu.vector_store %arg6[%c0_10, %c0_11], %10 {strides = array<i32>} : memref<256x128xf32, #tpu.memory_space<vmem>>, vector<256x128xf32>,
    return
  }
  func.func @transform_0(%arg0: i32) -> (i32, i32) {
    %c0_i32 = arith.constant 0 : i32
    %c0_i32_0 = arith.constant 0 : i32
    return %arg0, %c0_i32 : i32, i32
  }
  func.func @transform_1(%arg0: i32) -> (i32, i32) {
    %c0_i32 = arith.constant 0 : i32
    %c0_i32_0 = arith.constant 0 : i32
    %c0_i32_1 = arith.constant 0 : i32
    return %c0_i32, %c0_i32_0 : i32, i32
  }
  func.func @transform_2(%arg0: i32) -> (i32, i32) {
    %c0_i32 = arith.constant 0 : i32
    %c0_i32_0 = arith.constant 0 : i32
    %c0_i32_1 = arith.constant 0 : i32
    return %c0_i32, %c0_i32_0 : i32, i32
  }
  func.func @transform_3(%arg0: i32) -> (i32, i32) {
    %c0_i32 = arith.constant 0 : i32
    %c0_i32_0 = arith.constant 0 : i32
    %c0_i32_1 = arith.constant 0 : i32
    return %c0_i32, %c0_i32_0 : i32, i32
  }
  func.func @transform_4(%arg0: i32) -> (i32, i32) {
    %c0_i32 = arith.constant 0 : i32
    %c0_i32_0 = arith.constant 0 : i32
    %c0_i32_1 = arith.constant 0 : i32
    return %c0_i32, %c0_i32_0 : i32, i32
  }
  func.func @transform_5(%arg0: i32) -> (i32, i32) {
    %c0_i32 = arith.constant 0 : i32
    %c0_i32_0 = arith.constant 0 : i32
    return %arg0, %c0_i32 : i32, i32
  }
}

</mosaic_0001>

<bundles_post_ra>
// kernel: tpu_custom_call.1
= control target key start
LH: loop header
LB: loop body
LE: loop exit
PB: predicated region body
PF: predicated region fallthrough
CT: control target
= control target key end

     0   :  { %s3974_s0 = inlined_call_operand.vmem [shape: bf16[256,784], index: 0, kind: input, shape index: {}]   ;;  %s3975_s1 = inlined_call_operand.vmem [shape: bf16[784,128], index: 1, kind: input, shape index: {}]   ;;  %s3976_s2 = inlined_call_operand.vmem [shape: f32[1,128], index: 2, kind: input, shape index: {}]   ;;  %s3977_s3 = inlined_call_operand.vmem [shape: f32[128,128], index: 3, kind: input, shape index: {}]   ;;  %s3978_s4 = inlined_call_operand.vmem [shape: f32[1,128], index: 4, kind: input, shape index: {}]   ;;  %s3979_s5 = inlined_call_operand.hbm [shape: f32[256,128], index: 5, kind: output, shape index: {}]  }
   0x1   :  { %v2740_v0 = vld [vmem:[%s3975_s1 + $0x38] sm:$0xff]  ;;  %v2739_v4 = vld [vmem:[%s3975_s1 + $0x30] sm:$0xff]  ;;  %v2738_v8 = vld [vmem:[%s3975_s1 + $0x28] sm:$0xff] }
   0x2   :  { %v2748_v1 = vld [vmem:[%s3975_s1 + $0x78] sm:$0xff]  ;;  %1155 = vmatpush.bf16.msra.mxu0 %v2740_v0  ;;  %v2747_v5 = vld [vmem:[%s3975_s1 + $0x70] sm:$0xff]  ;;  %v2746_v9 = vld [vmem:[%s3975_s1 + $0x68] sm:$0xff] }
   0x3   :  { %v2756_v2 = vld [vmem:[%s3975_s1 + $0xb8] sm:$0xff]  ;;  %1244 = vmatpush.bf16.msra.mxu1 %v2748_v1  ;;  %v2755_v6 = vld [vmem:[%s3975_s1 + $0xb0] sm:$0xff]  ;;  %v2754_v10 = vld [vmem:[%s3975_s1 + $0xa8] sm:$0xff] }
   0x4   :  { %v2764_v3 = vld [vmem:[%s3975_s1 + $0xf8] sm:$0xff]  ;;  %1333 = vmatpush.bf16.msra.mxu2 %v2756_v2  ;;  %v2763_v7 = vld [vmem:[%s3975_s1 + $0xf0] sm:$0xff]  ;;  %v2762_v11 = vld [vmem:[%s3975_s1 + $0xe8] sm:$0xff] }
   0x5   :  { %1422 = vmatpush.bf16.msra.mxu3 %v2764_v3  ;;  %v2737_v12 = vld [vmem:[%s3975_s1 + $0x20] sm:$0xff]  ;;  %v2736_v16 = vld [vmem:[%s3975_s1 + $0x18] sm:$0xff] }
   0x6   :  { %1156 = vmatpush.bf16.msra.mxu0 %v2739_v4  ;;  %v2745_v13 = vld [vmem:[%s3975_s1 + $0x60] sm:$0xff]  ;;  %v2744_v17 = vld [vmem:[%s3975_s1 + $0x58] sm:$0xff] }
   0x7   :  { %1245 = vmatpush.bf16.msra.mxu1 %v2747_v5  ;;  %v2753_v14 = vld [vmem:[%s3975_s1 + $0xa0] sm:$0xff]  ;;  %v2752_v18 = vld [vmem:[%s3975_s1 + $0x98] sm:$0xff] }
   0x8   :  { %1334 = vmatpush.bf16.msra.mxu2 %v2755_v6  ;;  %v2761_v15 = vld [vmem:[%s3975_s1 + $0xe0] sm:$0xff]  ;;  %v2760_v19 = vld [vmem:[%s3975_s1 + $0xd8] sm:$0xff] }
   0x9   :  { %1423 = vmatpush.bf16.msra.mxu3 %v2763_v7 }
   0xa   :  { %1157 = vmatpush.bf16.msra.mxu0 %v2738_v8 }
   0xb   :  { %1246 = vmatpush.bf16.msra.mxu1 %v2746_v9 }
   0xc   :  { %1335 = vmatpush.bf16.msra.mxu2 %v2754_v10 }
   0xd   :  { %1424 = vmatpush.bf16.msra.mxu3 %v2762_v11 }
   0xe   :  { %1158 = vmatpush.bf16.msra.mxu0 %v2737_v12 }
   0xf   :  { %1247 = vmatpush.bf16.msra.mxu1 %v2745_v13 }
  0x10   :  { %1336 = vmatpush.bf16.msra.mxu2 %v2753_v14 }
  0x11   :  { %1425 = vmatpush.bf16.msra.mxu3 %v2761_v15 }
  0x12   :  { %10 = vsyncpa [#allocation3], 0  ;;  %1159 = vmatpush.bf16.msra.mxu0 %v2736_v16  ;;  %v2735_v20 = vld [vmem:[%s3975_s1 + $0x10] sm:$0xff]  ;;  %v2734_v24 = vld [vmem:[%s3975_s1 + $0x8] sm:$0xff]  ;;  %vm1106_vm0 = vcmask 130048   ;;  %s2814_s24 = smov 128  }
  0x13   :  { %1248 = vmatpush.bf16.msra.mxu1 %v2744_v17  ;;  %v2743_v21 = vld [vmem:[%s3975_s1 + $0x50] sm:$0xff]  ;;  %v2742_v25 = vld [vmem:[%s3975_s1 + $0x48] sm:$0xff]  ;;  %v2733_v28 = vld [vmem:[%s3975_s1] sm:$0xff]  ;;  %s2815_s25 = smov 8  }
  0x14   :  { %1337 = vmatpush.bf16.msra.mxu2 %v2752_v18  ;;  %v2751_v22 = vld [vmem:[%s3975_s1 + $0x90] sm:$0xff]  ;;  %v2750_v26 = vld [vmem:[%s3975_s1 + $0x88] sm:$0xff]  ;;  %v2741_v29 = vld [vmem:[%s3975_s1 + $0x40] sm:$0xff] }
  0x15   :  { %1426 = vmatpush.bf16.msra.mxu3 %v2760_v19  ;;  %v2759_v23 = vld [vmem:[%s3975_s1 + $0xd0] sm:$0xff]  ;;  %v2758_v27 = vld [vmem:[%s3975_s1 + $0xc8] sm:$0xff]  ;;  %v2749_v30 = vld [vmem:[%s3975_s1 + $0x80] sm:$0xff] }
  0x16   :  { %1160 = vmatpush.bf16.msra.mxu0 %v2735_v20  ;;  %v2757_v31 = vld [vmem:[%s3975_s1 + $0xc0] sm:$0xff]  ;;  %v2624_v33 = vld [vmem:[%s3974_s0 + $0x18] sm:$0xf0]  ;;  %v1971_v36 = vld [vmem:[%s3974_s0 + $0x8] sm:$0xf] }
  0x17   :  { %1249 = vmatpush.bf16.msra.mxu1 %v2743_v21  ;;  %v1963_v32 = vld [vmem:[%s3974_s0] sm:$0xf]  ;;  %v2621_v34 = vld [vmem:[%s3974_s0 + $0x4] sm:$0xf]  ;;  %v2622_v38 = vld [vmem:[%s3974_s0 + $0xc] sm:$0xf] }
  0x18   :  { %1338 = vmatpush.bf16.msra.mxu2 %v2751_v22  ;;  %v1965_v35 = vld [vmem:[%s3974_s0 + $0x1c] sm:$0xf0]  ;;  %v2625_v37 = vld [vmem:[%s3974_s0 + $0x20] sm:$0xf0]  ;;  %v1973_v39 = vld [vmem:[%s3974_s0 + $0x24] sm:$0xf0]  ;;  %v1964_v42 = vor.u32 %v2624_v33, %v1963_v32 }
  0x19   :  { %1427 = vmatpush.bf16.msra.mxu3 %v2759_v23  ;;  %v2781_v40 = vld [vmem:[%s3975_s1 + $0x180] sm:$0xff]  ;;  %v2772_v41 = vld [vmem:[%s3975_s1 + $0x138] sm:$0xff]  ;;  %v1968_v43 = vor.u32 %v2621_v34, %v1965_v35  ;;  %v1972_v44 = vor.u32 %v2625_v37, %v1971_v36  ;;  %v1976_v45 = vor.u32 %v2622_v38, %v1973_v39  ;;  %v2771_v47 = vld [vmem:[%s3975_s1 + $0x130] sm:$0xff] }
  0x1a   :  { %1161 = vmatpush.bf16.msra.mxu0 %v2734_v24  ;;  %v2780_v46 = vld [vmem:[%s3975_s1 + $0x178] sm:$0xff]  ;;  %v2779_v48 = vld [vmem:[%s3975_s1 + $0x170] sm:$0xff]  ;;  %v1999_v53 = vld [vmem:[%s3974_s0 + $0x40] sm:$0xf] }
  0x1b   :  { %1250 = vmatpush.bf16.msra.mxu1 %v2742_v25  ;;  %v1991_v49 = vld [vmem:[%s3974_s0 + $0x38] sm:$0xf]  ;;  %v2631_v50 = vld [vmem:[%s3974_s0 + $0x50] sm:$0xf0]  ;;  %v2628_v51 = vld [vmem:[%s3974_s0 + $0x3c] sm:$0xf] }
  0x1c   :  { %1339 = vmatpush.bf16.msra.mxu2 %v2750_v26  ;;  %v1993_v52 = vld [vmem:[%s3974_s0 + $0x54] sm:$0xf0]  ;;  %v2632_v54 = vld [vmem:[%s3974_s0 + $0x58] sm:$0xf0]  ;;  %v2629_v55 = vld [vmem:[%s3974_s0 + $0x44] sm:$0xf]  ;;  %v1992_v57 = vor.u32 %v2631_v50, %v1991_v49 }
  0x1d   :  { %1428 = vmatpush.bf16.msra.mxu3 %v2758_v27  ;;  %v2001_v56 = vld [vmem:[%s3974_s0 + $0x5c] sm:$0xf0]  ;;  %v1996_v58 = vor.u32 %v2628_v51, %v1993_v52  ;;  %v2000_v59 = vor.u32 %v2632_v54, %v1999_v53  ;;  %v2019_v61 = vld [vmem:[%s3974_s0 + $0x70] sm:$0xf]  ;;  %v2638_v62 = vld [vmem:[%s3974_s0 + $0x88] sm:$0xf0] }
  0x1e   :  { %1162 = vmatpush.bf16.msra.mxu0 %v2733_v28  ;;  %v2004_v60 = vor.u32 %v2629_v55, %v2001_v56  ;;  %v2635_v63 = vld [vmem:[%s3974_s0 + $0x74] sm:$0xf]  ;;  %v2021_v0 = vld [vmem:[%s3974_s0 + $0x8c] sm:$0xf0]  ;;  %v2027_v1 = vld [vmem:[%s3974_s0 + $0x78] sm:$0xf]  ;;  %v2020_v5 = vor.u32 %v2638_v62, %v2019_v61 }
  0x1f   :  { %1251 = vmatpush.bf16.msra.mxu1 %v2741_v29  ;;  %v2639_v2 = vld [vmem:[%s3974_s0 + $0x90] sm:$0xf0]  ;;  %v2636_v3 = vld [vmem:[%s3974_s0 + $0x7c] sm:$0xf]  ;;  %v2029_v4 = vld [vmem:[%s3974_s0 + $0x94] sm:$0xf0]  ;;  %v2024_v6 = vor.u32 %v2635_v63, %v2021_v0 }
  0x20   :  { %1340 = vmatpush.bf16.msra.mxu2 %v2749_v30  ;;  %v2028_v7 = vor.u32 %v2639_v2, %v2027_v1  ;;  %v2032_v8 = vor.u32 %v2636_v3, %v2029_v4  ;;  %v2770_v9 = vld [vmem:[%s3975_s1 + $0x128] sm:$0xff]  ;;  %v2645_v12 = vld [vmem:[%s3974_s0 + $0xc0] sm:$0xf0]  ;;  %v2055_v15 = vld [vmem:[%s3974_s0 + $0xb0] sm:$0xf] }
  0x21   :  { %1429 = vmatpush.bf16.msra.mxu3 %v2757_v31  ;;  %1163 = vmatmul.bf16.vlgmr.msra.gmra.mxu0 %v1964_v42  ;;  %v2778_v10 = vld [vmem:[%s3975_s1 + $0x168] sm:$0xff]  ;;  %v2643_v17 = vld [vmem:[%s3974_s0 + $0xb4] sm:$0xf]  ;;  %v2057_v18 = vld [vmem:[%s3974_s0 + $0xcc] sm:$0xf0] }
  0x22   :  { %1511 = vmatpush.bf16.msrb.mxu0 %v2772_v41  ;;  %1252 = vmatmul.bf16.vlgmr.msra.gmra.mxu1 %v1968_v43  ;;  %v2047_v11 = vld [vmem:[%s3974_s0 + $0xa8] sm:$0xf]  ;;  %v2642_v13 = vld [vmem:[%s3974_s0 + $0xac] sm:$0xf]  ;;  %v2060_v22 = vor.u32 %v2643_v17, %v2057_v18  ;;  %v2075_v23 = vld [vmem:[%s3974_s0 + $0xe0] sm:$0xf] }
  0x23   :  { %1341 = vmatmul.bf16.vlgmr.msra.gmra.mxu2 %v1972_v44  ;;  %1600 = vmatpush.bf16.msrb.mxu1 %v2780_v46  ;;  %v2049_v14 = vld [vmem:[%s3974_s0 + $0xc4] sm:$0xf0]  ;;  %v2646_v16 = vld [vmem:[%s3974_s0 + $0xc8] sm:$0xf0]  ;;  %v2048_v19 = vor.u32 %v2645_v12, %v2047_v11  ;;  %v2652_v24 = vld [vmem:[%s3974_s0 + $0xf8] sm:$0xf0] }
  0x24   :  { %1696 = vmatpush.bf16.msrb.mxu2 %v2781_v40  ;;  %1430 = vmatmul.bf16.vlgmr.msra.gmra.mxu3 %v1976_v45  ;;  %v2052_v20 = vor.u32 %v2642_v13, %v2049_v14  ;;  %v2056_v21 = vor.u32 %v2646_v16, %v2055_v15  ;;  %v2649_v25 = vld [vmem:[%s3974_s0 + $0xe4] sm:$0xf]  ;;  %v2077_v26 = vld [vmem:[%s3974_s0 + $0xfc] sm:$0xf0]  ;;  %v2083_v27 = vld [vmem:[%s3974_s0 + $0xe8] sm:$0xf]  ;;  %v2076_v31 = vor.u32 %v2652_v24, %v2075_v23 }
  0x25   :  { %v2653_v28 = vld [vmem:[%s3974_s0 + $0x100] sm:$0xf0]  ;;  %v2650_v29 = vld [vmem:[%s3974_s0 + $0xec] sm:$0xf]  ;;  %v2085_v30 = vld [vmem:[%s3974_s0 + $0x104] sm:$0xf0]  ;;  %v2080_v32 = vor.u32 %v2649_v25, %v2077_v26 }
  0x26   :  { %1512 = vmatpush.bf16.msrb.mxu0 %v2771_v47  ;;  %v2084_v33 = vor.u32 %v2653_v28, %v2083_v27  ;;  %v2088_v34 = vor.u32 %v2650_v29, %v2085_v30  ;;  %v2769_v35 = vld [vmem:[%s3975_s1 + $0x120] sm:$0xff]  ;;  %v2103_v37 = vld [vmem:[%s3974_s0 + $0x118] sm:$0xf]  ;;  %v2659_v38 = vld [vmem:[%s3974_s0 + $0x130] sm:$0xf0] }
  0x27   :  { %1601 = vmatpush.bf16.msrb.mxu1 %v2779_v48  ;;  %v2777_v36 = vld [vmem:[%s3975_s1 + $0x160] sm:$0xff]  ;;  %v2656_v39 = vld [vmem:[%s3974_s0 + $0x11c] sm:$0xf]  ;;  %v2105_v40 = vld [vmem:[%s3974_s0 + $0x134] sm:$0xf0]  ;;  %v2104_v45 = vor.u32 %v2659_v38, %v2103_v37 }
  0x28   :  { %v2111_v41 = vld [vmem:[%s3974_s0 + $0x120] sm:$0xf]  ;;  %v2660_v42 = vld [vmem:[%s3974_s0 + $0x138] sm:$0xf0]  ;;  %v2657_v43 = vld [vmem:[%s3974_s0 + $0x124] sm:$0xf]  ;;  %v2108_v46 = vor.u32 %v2656_v39, %v2105_v40 }
  0x29   :  { %v2113_v44 = vld [vmem:[%s3974_s0 + $0x13c] sm:$0xf0]  ;;  %v2112_v47 = vor.u32 %v2660_v42, %v2111_v41  ;;  %v2131_v49 = vld [vmem:[%s3974_s0 + $0x150] sm:$0xf]  ;;  %v2666_v50 = vld [vmem:[%s3974_s0 + $0x168] sm:$0xf0] }
  0x2a   :  { %1513 = vmatpush.bf16.msrb.mxu0 %v2770_v9  ;;  %v2116_v48 = vor.u32 %v2657_v43, %v2113_v44  ;;  %v2663_v51 = vld [vmem:[%s3974_s0 + $0x154] sm:$0xf]  ;;  %v2133_v52 = vld [vmem:[%s3974_s0 + $0x16c] sm:$0xf0]  ;;  %v2139_v53 = vld [vmem:[%s3974_s0 + $0x158] sm:$0xf] }
  0x2b   :  { %1602 = vmatpush.bf16.msrb.mxu1 %v2778_v10  ;;  %v2667_v54 = vld [vmem:[%s3974_s0 + $0x170] sm:$0xf0]  ;;  %v2664_v55 = vld [vmem:[%s3974_s0 + $0x15c] sm:$0xf]  ;;  %v2141_v56 = vld [vmem:[%s3974_s0 + $0x174] sm:$0xf0] }
  0x2c   :  { %v2768_v61 = vld [vmem:[%s3975_s1 + $0x118] sm:$0xff]  ;;  %v2159_v63 = vld [vmem:[%s3974_s0 + $0x188] sm:$0xf]  ;;  %v2673_v0 = vld [vmem:[%s3974_s0 + $0x1a0] sm:$0xf0] }
  0x2d   :  { %v2776_v62 = vld [vmem:[%s3975_s1 + $0x158] sm:$0xff]  ;;  %v2670_v2 = vld [vmem:[%s3974_s0 + $0x18c] sm:$0xf]  ;;  %v2161_v3 = vld [vmem:[%s3974_s0 + $0x1a4] sm:$0xf0] }
  0x2e   :  { %1514 = vmatpush.bf16.msrb.mxu0 %v2769_v35  ;;  %v1793_v1 = vld [vmem:[%s3977_s3 + $0x78] sm:$0xff]  ;;  %v2167_v4 = vld [vmem:[%s3974_s0 + $0x190] sm:$0xf]  ;;  %v2164_v9 = vor.u32 %v2670_v2, %v2161_v3  ;;  %v3173_v12 = vld [vmem:[%s3976_s2] ss:$0 sm:$0xff] }
  0x2f   :  { %1603 = vmatpush.bf16.msrb.mxu1 %v2777_v36  ;;  %1798 = vmatpush.msrb.mxu3 %v1793_v1  ;;  %v2187_v13 = vld [vmem:[%s3974_s0 + $0x1c0] sm:$0xf]  ;;  %v2680_v14 = vld [vmem:[%s3974_s0 + $0x1d8] sm:$0xf0]  ;;  %v1792_v15 = vld [vmem:[%s3977_s3 + $0x70] sm:$0xff] }
  0x30   :  { %v2677_v16 = vld [vmem:[%s3974_s0 + $0x1c4] sm:$0xf]  ;;  %v2189_v17 = vld [vmem:[%s3974_s0 + $0x1dc] sm:$0xf0]  ;;  %v2195_v18 = vld [vmem:[%s3974_s0 + $0x1c8] sm:$0xf] }
  0x31   :  { %1168 = vmatmul.bf16.gmra.mxu0 %v1992_v57  ;;  %v2132_v57 = vor.u32 %v2666_v50, %v2131_v49  ;;  %1799 = vmatpush.msrb.mxu3 %v1792_v15  ;;  %v2192_v23 = vor.u32 %v2677_v16, %v2189_v17  ;;  %v2767_v30 = vld [vmem:[%s3975_s1 + $0x110] sm:$0xff]  ;;  %v2215_v40 = vld [vmem:[%s3974_s0 + $0x1f8] sm:$0xf]  ;;  %v1791_v42 = vld [vmem:[%s3977_s3 + $0x68] sm:$0xff] }
  0x32   :  { %1257 = vmatmul.bf16.gmra.mxu1 %v1996_v58  ;;  %v2136_v58 = vor.u32 %v2663_v51, %v2133_v52  ;;  %1515 = vmatpush.bf16.msrb.mxu0 %v2768_v61  ;;  %v2775_v36 = vld [vmem:[%s3975_s1 + $0x150] sm:$0xff]  ;;  %v2684_v43 = vld [vmem:[%s3974_s0 + $0x1fc] sm:$0xf]  ;;  %v2217_v44 = vld [vmem:[%s3974_s0 + $0x214] sm:$0xf0] }
  0x33   :  { %1346 = vmatmul.bf16.gmra.mxu2 %v2000_v59  ;;  %v2140_v59 = vor.u32 %v2667_v54, %v2139_v53  ;;  %1604 = vmatpush.bf16.msrb.mxu1 %v2776_v62  ;;  %v2687_v41 = vld [vmem:[%s3974_s0 + $0x210] sm:$0xf0]  ;;  %v2220_v52 = vor.u32 %v2684_v43, %v2217_v44  ;;  %v2279_v43 = vld [vmem:[%s3974_s0 + $0x270] sm:$0xf]  ;;  %v2702_v44 = vld [vmem:[%s3974_s0 + $0x288] sm:$0xf0] }
  0x34   :  { %1435 = vmatmul.bf16.gmra.mxu3 %v2004_v60  ;;  %v2144_v60 = vor.u32 %v2664_v55, %v2141_v56  ;;  %v2216_v51 = vor.u32 %v2687_v41, %v2215_v40  ;;  %v1789_v40 = vld [vmem:[%s3977_s3 + $0x58] sm:$0xff]  ;;  %v2698_v41 = vld [vmem:[%s3974_s0 + $0x26c] sm:$0xf] }
  0x35   :  { %1800 = vmatpush.msrb.mxu3 %v1791_v42  ;;  %v2273_v42 = vld [vmem:[%s3974_s0 + $0x284] sm:$0xf0] }
  0x36   :  { %1516 = vmatpush.bf16.msrb.mxu0 %v2767_v30 }
  0x37   :  { %1605 = vmatpush.bf16.msrb.mxu1 %v2775_v36 }
  0x41   :  { %1173 = vmatmul.bf16.gmra.mxu0 %v2020_v5  ;;  %v2674_v5 = vld [vmem:[%s3974_s0 + $0x1a8] sm:$0xf0] }
  0x42   :  { %1262 = vmatmul.bf16.gmra.mxu1 %v2024_v6  ;;  %v2671_v6 = vld [vmem:[%s3974_s0 + $0x194] sm:$0xf]  ;;  %v2168_v10 = vor.u32 %v2674_v5, %v2167_v4  ;;  %v2243_v5 = vld [vmem:[%s3974_s0 + $0x230] sm:$0xf] }
  0x43   :  { %1351 = vmatmul.bf16.gmra.mxu2 %v2028_v7  ;;  %v2169_v7 = vld [vmem:[%s3974_s0 + $0x1ac] sm:$0xf0] }
  0x44   :  { %1440 = vmatmul.bf16.gmra.mxu3 %v2032_v8  ;;  %v2160_v8 = vor.u32 %v2673_v0, %v2159_v63  ;;  %v2172_v11 = vor.u32 %v2671_v6, %v2169_v7  ;;  %v2694_v6 = vld [vmem:[%s3974_s0 + $0x248] sm:$0xf0]  ;;  %v1790_v7 = vld [vmem:[%s3977_s3 + $0x60] sm:$0xff] }
  0x45   :  { %1801 = vmatpush.msrb.mxu3 %v1790_v7  ;;  %v2244_v17 = vor.u32 %v2694_v6, %v2243_v5  ;;  %v2299_v5 = vld [vmem:[%s3974_s0 + $0x2a0] sm:$0xf]  ;;  %v2708_v6 = vld [vmem:[%s3974_s0 + $0x2b8] sm:$0xf0]  ;;  %v1788_v7 = vld [vmem:[%s3977_s3 + $0x50] sm:$0xff] }
  0x47   :  { %1802 = vmatpush.msrb.mxu3 %v1789_v40  ;;  %v1787_v40 = vld [vmem:[%s3977_s3 + $0x48] sm:$0xff] }
  0x49   :  { %1803 = vmatpush.msrb.mxu3 %v1788_v7  ;;  %v2357_v7 = vld [vmem:[%s3974_s0 + $0x32c] sm:$0xf0] }
  0x4b   :  { %1804 = vmatpush.msrb.mxu3 %v1787_v40  ;;  %v2730_v40 = vld [vmem:[%s3974_s0 + $0x368] sm:$0xf0] }
  0x51   :  { %1178 = vmatmul.bf16.gmra.mxu0 %v2048_v19  ;;  %v2681_v19 = vld [vmem:[%s3974_s0 + $0x1e0] sm:$0xf0] }
  0x52   :  { %1267 = vmatmul.bf16.gmra.mxu1 %v2052_v20  ;;  %v2678_v20 = vld [vmem:[%s3974_s0 + $0x1cc] sm:$0xf]  ;;  %v2196_v26 = vor.u32 %v2681_v19, %v2195_v18 }
  0x53   :  { %1356 = vmatmul.bf16.gmra.mxu2 %v2056_v21  ;;  %v2197_v21 = vld [vmem:[%s3974_s0 + $0x1e4] sm:$0xf0] }
  0x54   :  { %1445 = vmatmul.bf16.gmra.mxu3 %v2060_v22  ;;  %v2188_v22 = vor.u32 %v2680_v14, %v2187_v13  ;;  %v2200_v27 = vor.u32 %v2678_v20, %v2197_v21  ;;  %v2692_v13 = vld [vmem:[%s3974_s0 + $0x23c] sm:$0xf]  ;;  %v2253_v14 = vld [vmem:[%s3974_s0 + $0x254] sm:$0xf0] }
  0x61   :  { %1183 = vmatmul.bf16.gmra.mxu0 %v2076_v31 }
  0x62   :  { %1272 = vmatmul.bf16.gmra.mxu1 %v2080_v32 }
  0x63   :  { %1361 = vmatmul.bf16.gmra.mxu2 %v2084_v33 }
  0x64   :  { %1450 = vmatmul.bf16.gmra.mxu3 %v2088_v34 }
  0x71   :  { %1188 = vmatmul.bf16.gmra.mxu0 %v2104_v45  ;;  %v2223_v45 = vld [vmem:[%s3974_s0 + $0x200] sm:$0xf] }
  0x72   :  { %1277 = vmatmul.bf16.gmra.mxu1 %v2108_v46  ;;  %v2688_v46 = vld [vmem:[%s3974_s0 + $0x218] sm:$0xf0] }
  0x73   :  { %1366 = vmatmul.bf16.gmra.mxu2 %v2112_v47  ;;  %v2685_v47 = vld [vmem:[%s3974_s0 + $0x204] sm:$0xf]  ;;  %v2224_v56 = vor.u32 %v2688_v46, %v2223_v45  ;;  %v2699_v45 = vld [vmem:[%s3974_s0 + $0x274] sm:$0xf]  ;;  %v2281_v46 = vld [vmem:[%s3974_s0 + $0x28c] sm:$0xf0] }
  0x74   :  { %1455 = vmatmul.bf16.gmra.mxu3 %v2116_v48  ;;  %v2225_v48 = vld [vmem:[%s3974_s0 + $0x21c] sm:$0xf0] }
  0x81   :  { %1193 = vmatmul.bf16.gmra.mxu0 %v2132_v57  ;;  %v2228_v57 = vor.u32 %v2685_v47, %v2225_v48 }
  0x82   :  { %1282 = vmatmul.bf16.gmra.mxu1 %v2136_v58 }
  0x83   :  { %1371 = vmatmul.bf16.gmra.mxu2 %v2140_v59 }
  0x84   :  { %1460 = vmatmul.bf16.gmra.mxu3 %v2144_v60 }
  0x91   :  { %1198 = vmatmul.bf16.gmra.mxu0 %v2160_v8  ;;  %v2691_v8 = vld [vmem:[%s3974_s0 + $0x234] sm:$0xf] }
  0x92   :  { %1287 = vmatmul.bf16.gmra.mxu1 %v2164_v9  ;;  %v2245_v9 = vld [vmem:[%s3974_s0 + $0x24c] sm:$0xf0] }
  0x93   :  { %1376 = vmatmul.bf16.gmra.mxu2 %v2168_v10  ;;  %v2251_v10 = vld [vmem:[%s3974_s0 + $0x238] sm:$0xf]  ;;  %v2248_v18 = vor.u32 %v2691_v8, %v2245_v9  ;;  %v2705_v8 = vld [vmem:[%s3974_s0 + $0x2a4] sm:$0xf]  ;;  %v2301_v9 = vld [vmem:[%s3974_s0 + $0x2bc] sm:$0xf0] }
  0x94   :  { %1465 = vmatmul.bf16.gmra.mxu3 %v2172_v11  ;;  %v2695_v11 = vld [vmem:[%s3974_s0 + $0x250] sm:$0xf0] }
  0x9e   :  { %v1164_v24 = vpop.f32.mrf.mxu0 }
  0x9f   :  { %v1253_v25 = vpop.f32.mrf.mxu1  ;;  %v1165_v28 = vadd.f32 %v3173_v12, %v1164_v24 }
  0xa1   :  { %v1254_v29 = vadd.f32 %v1253_v25, %v1165_v28  ;;  %1203 = vmatmul.bf16.gmra.mxu0 %v2188_v22  ;;  %v2252_v22 = vor.u32 %v2695_v11, %v2251_v10  ;;  %v2307_v10 = vld [vmem:[%s3974_s0 + $0x2a8] sm:$0xf]  ;;  %v2709_v11 = vld [vmem:[%s3974_s0 + $0x2c0] sm:$0xf0] }
  0xa2   :  { %1292 = vmatmul.bf16.gmra.mxu1 %v2192_v23  ;;  %v2256_v23 = vor.u32 %v2692_v13, %v2253_v14  ;;  %v2706_v13 = vld [vmem:[%s3974_s0 + $0x2ac] sm:$0xf]  ;;  %v2309_v14 = vld [vmem:[%s3974_s0 + $0x2c4] sm:$0xf0] }
  0xa3   :  { %1381 = vmatmul.bf16.gmra.mxu2 %v2196_v26 }
  0xa4   :  { %1470 = vmatmul.bf16.gmra.mxu3 %v2200_v27  ;;  %v2766_v27 = vld [vmem:[%s3975_s1 + $0x108] sm:$0xff] }
  0xa5   :  { %1517 = vmatpush.bf16.msrb.mxu0 %v2766_v27 }
  0xa6   :  { %v1342_v31 = vpop.f32.mrf.mxu2  ;;  %v1166_v34 = vpop.f32.mrf.mxu0 }
  0xa7   :  { %v1431_v32 = vpop.f32.mrf.mxu3  ;;  %v1343_v33 = vadd.f32 %v1342_v31, %v1254_v29  ;;  %v1255_v35 = vpop.f32.mrf.mxu1  ;;  %v1167_v37 = vadd.f32 %v3173_v12, %v1166_v34 }
  0xa9   :  { %v3210_v38 = vadd.f32 %v1431_v32, %v1343_v33  ;;  %v1256_v39 = vadd.f32 %v1255_v35, %v1167_v37  ;;  %v2774_v33 = vld [vmem:[%s3975_s1 + $0x148] sm:$0xff] }
  0xaa   :  { %1606 = vmatpush.bf16.msrb.mxu1 %v2774_v33  ;;  %v2271_v37 = vld [vmem:[%s3974_s0 + $0x268] sm:$0xf]  ;;  %v2773_v33 = vld [vmem:[%s3975_s1 + $0x140] sm:$0xff] }
  0xae   :  { %v1344_v49 = vpop.f32.mrf.mxu2  ;;  %v1169_v54 = vpop.f32.mrf.mxu0  ;;  %1607 = vmatpush.bf16.msrb.mxu1 %v2773_v33  ;;  %v2729_v33 = vld [vmem:[%s3974_s0 + $0x360] sm:$0xf0] }
  0xaf   :  { %v1433_v50 = vpop.f32.mrf.mxu3  ;;  %v1345_v53 = vadd.f32 %v1344_v49, %v1256_v39  ;;  %v1258_v55 = vpop.f32.mrf.mxu1  ;;  %v1170_v58 = vadd.f32 %v3173_v12, %v1169_v54  ;;  %v2701_v39 = vld [vmem:[%s3974_s0 + $0x280] sm:$0xf0]  ;;  %v2280_v54 = vor.u32 %v2702_v44, %v2279_v43  ;;  %v2335_v43 = vld [vmem:[%s3974_s0 + $0x2e0] sm:$0xf]  ;;  %v2716_v44 = vld [vmem:[%s3974_s0 + $0x2f8] sm:$0xf0] }
  0xb0   :  { %v2272_v49 = vor.u32 %v2701_v39, %v2271_v37  ;;  %v2327_v37 = vld [vmem:[%s3974_s0 + $0x2d8] sm:$0xf]  ;;  %v2715_v39 = vld [vmem:[%s3974_s0 + $0x2f0] sm:$0xf0] }
  0xb1   :  { %v3240_v59 = vadd.f32 %v1433_v50, %v1345_v53  ;;  %v1259_v60 = vadd.f32 %v1258_v55, %v1170_v58  ;;  %1208 = vmatmul.bf16.gmra.mxu0 %v2216_v51  ;;  %v2276_v50 = vor.u32 %v2698_v41, %v2273_v42  ;;  %v2284_v55 = vor.u32 %v2699_v45, %v2281_v46  ;;  %v2712_v41 = vld [vmem:[%s3974_s0 + $0x2dc] sm:$0xf]  ;;  %v2329_v42 = vld [vmem:[%s3974_s0 + $0x2f4] sm:$0xf0]  ;;  %v2713_v45 = vld [vmem:[%s3974_s0 + $0x2e4] sm:$0xf] }
  0xb2   :  { %1297 = vmatmul.bf16.gmra.mxu1 %v2220_v52  ;;  %v2337_v46 = vld [vmem:[%s3974_s0 + $0x2fc] sm:$0xf0] }
  0xb3   :  { %1386 = vmatmul.bf16.gmra.mxu2 %v2224_v56 }
  0xb4   :  { %1475 = vmatmul.bf16.gmra.mxu3 %v2228_v57 }
  0xb6   :  { %v1347_v61 = vpop.f32.mrf.mxu2  ;;  %v1171_v0 = vpop.f32.mrf.mxu0 }
  0xb7   :  { %v1436_v62 = vpop.f32.mrf.mxu3  ;;  %v1348_v63 = vadd.f32 %v1347_v61, %v1259_v60  ;;  %v1260_v1 = vpop.f32.mrf.mxu1  ;;  %v1172_v2 = vadd.f32 %v3173_v12, %v1171_v0 }
  0xb9   :  { %v3243_v3 = vadd.f32 %v1436_v62, %v1348_v63  ;;  %v1261_v4 = vadd.f32 %v1260_v1, %v1172_v2 }
  0xbe   :  { %v1349_v15 = vpop.f32.mrf.mxu2  ;;  %v1174_v20 = vpop.f32.mrf.mxu0 }
  0xbf   :  { %v1438_v16 = vpop.f32.mrf.mxu3  ;;  %v1350_v19 = vadd.f32 %v1349_v15, %v1261_v4  ;;  %v1263_v21 = vpop.f32.mrf.mxu1  ;;  %v1175_v24 = vadd.f32 %v3173_v12, %v1174_v20 }
  0xc1   :  { %v3273_v25 = vadd.f32 %v1438_v16, %v1350_v19  ;;  %v1264_v26 = vadd.f32 %v1263_v21, %v1175_v24  ;;  %1213 = vmatmul.bf16.gmra.mxu0 %v2244_v17  ;;  %v2300_v17 = vor.u32 %v2708_v6, %v2299_v5  ;;  %v1786_v5 = vld [vmem:[%s3977_s3 + $0x40] sm:$0xff]  ;;  %v2719_v6 = vld [vmem:[%s3974_s0 + $0x314] sm:$0xf] }
  0xc2   :  { %1302 = vmatmul.bf16.gmra.mxu1 %v2248_v18  ;;  %v2304_v18 = vor.u32 %v2705_v8, %v2301_v9  ;;  %v2363_v8 = vld [vmem:[%s3974_s0 + $0x318] sm:$0xf]  ;;  %1805 = vmatpush.msrb.mxu3 %v1786_v5  ;;  %v2723_v9 = vld [vmem:[%s3974_s0 + $0x330] sm:$0xf0]  ;;  %v1981_v5 = vld [vmem:[%s3974_s0 + $0x2c] sm:$0xf0] }
  0xc3   :  { %1391 = vmatmul.bf16.gmra.mxu2 %v2252_v22  ;;  %v2308_v22 = vor.u32 %v2709_v11, %v2307_v10  ;;  %v2720_v10 = vld [vmem:[%s3974_s0 + $0x31c] sm:$0xf]  ;;  %v2365_v11 = vld [vmem:[%s3974_s0 + $0x334] sm:$0xf0] }
  0xc4   :  { %1480 = vmatmul.bf16.gmra.mxu3 %v2256_v23  ;;  %v2312_v23 = vor.u32 %v2706_v13, %v2309_v14 }
  0xc6   :  { %v1352_v28 = vpop.f32.mrf.mxu2  ;;  %v1176_v31 = vpop.f32.mrf.mxu0 }
  0xc7   :  { %v1441_v29 = vpop.f32.mrf.mxu3  ;;  %v1353_v30 = vadd.f32 %v1352_v28, %v1264_v26  ;;  %v1265_v32 = vpop.f32.mrf.mxu1  ;;  %v1177_v34 = vadd.f32 %v3173_v12, %v1176_v31  ;;  %v2765_v28 = vld [vmem:[%s3975_s1 + $0x100] sm:$0xff] }
  0xc8   :  { %1518 = vmatpush.bf16.msrb.mxu0 %v2765_v28 }
  0xc9   :  { %v3282_v35 = vadd.f32 %v1441_v29, %v1353_v30  ;;  %v1266_v36 = vadd.f32 %v1265_v32, %v1177_v34 }
  0xce   :  { %v1354_v47 = vpop.f32.mrf.mxu2  ;;  %v1179_v52 = vpop.f32.mrf.mxu0 }
  0xcf   :  { %v1443_v48 = vpop.f32.mrf.mxu3  ;;  %v1355_v51 = vadd.f32 %v1354_v47, %v1266_v36  ;;  %v1268_v53 = vpop.f32.mrf.mxu1  ;;  %v1180_v56 = vadd.f32 %v3173_v12, %v1179_v52 }
  0xd1   :  { %v3312_v57 = vadd.f32 %v1443_v48, %v1355_v51  ;;  %v1269_v58 = vadd.f32 %v1268_v53, %v1180_v56  ;;  %1218 = vmatmul.bf16.gmra.mxu0 %v2272_v49  ;;  %v2328_v48 = vor.u32 %v2715_v39, %v2327_v37  ;;  %v2332_v49 = vor.u32 %v2712_v41, %v2329_v42  ;;  %v2385_v37 = vld [vmem:[%s3974_s0 + $0x364] sm:$0xf0]  ;;  %v2391_v39 = vld [vmem:[%s3974_s0 + $0x350] sm:$0xf]  ;;  %v2727_v41 = vld [vmem:[%s3974_s0 + $0x354] sm:$0xf] }
  0xd2   :  { %1307 = vmatmul.bf16.gmra.mxu1 %v2276_v50  ;;  %v2336_v53 = vor.u32 %v2716_v44, %v2335_v43  ;;  %v2393_v42 = vld [vmem:[%s3974_s0 + $0x36c] sm:$0xf0] }
  0xd3   :  { %1396 = vmatmul.bf16.gmra.mxu2 %v2280_v54  ;;  %v2340_v54 = vor.u32 %v2713_v45, %v2337_v46 }
  0xd4   :  { %1485 = vmatmul.bf16.gmra.mxu3 %v2284_v55 }
  0xd6   :  { %v1357_v60 = vpop.f32.mrf.mxu2  ;;  %v1181_v63 = vpop.f32.mrf.mxu0 }
  0xd7   :  { %v1446_v61 = vpop.f32.mrf.mxu3  ;;  %v1358_v62 = vadd.f32 %v1357_v60, %v1269_v58  ;;  %v1270_v0 = vpop.f32.mrf.mxu1  ;;  %v1182_v1 = vadd.f32 %v3173_v12, %v1181_v63 }
  0xd9   :  { %v3315_v2 = vadd.f32 %v1446_v61, %v1358_v62  ;;  %v1271_v4 = vadd.f32 %v1270_v0, %v1182_v1  ;;  %v2355_v1 = vld [vmem:[%s3974_s0 + $0x310] sm:$0xf] }
  0xde   :  { %v1359_v15 = vpop.f32.mrf.mxu2  ;;  %v1184_v20 = vpop.f32.mrf.mxu0 }
  0xdf   :  { %v1448_v16 = vpop.f32.mrf.mxu3  ;;  %v1360_v19 = vadd.f32 %v1359_v15, %v1271_v4  ;;  %v1273_v21 = vpop.f32.mrf.mxu1  ;;  %v1185_v24 = vadd.f32 %v3173_v12, %v1184_v20  ;;  %v2722_v4 = vld [vmem:[%s3974_s0 + $0x328] sm:$0xf0]  ;;  %v2360_v15 = vor.u32 %v2719_v6, %v2357_v7  ;;  %v2368_v20 = vor.u32 %v2720_v10, %v2365_v11  ;;  %v1987_v6 = vld [vmem:[%s3974_s0 + $0x18] sm:$0xf]  ;;  %v2627_v7 = vld [vmem:[%s3974_s0 + $0x30] sm:$0xf0] }
  0xe0   :  { %v2356_v14 = vor.u32 %v2722_v4, %v2355_v1  ;;  %v2626_v1 = vld [vmem:[%s3974_s0 + $0x28] sm:$0xf0]  ;;  %v2623_v4 = vld [vmem:[%s3974_s0 + $0x14] sm:$0xf] }
  0xe1   :  { %v3345_v26 = vadd.f32 %v1448_v16, %v1360_v19  ;;  %v1274_v27 = vadd.f32 %v1273_v21, %v1185_v24  ;;  %1223 = vmatmul.bf16.gmra.mxu0 %v2300_v17  ;;  %v2364_v19 = vor.u32 %v2723_v9, %v2363_v8  ;;  %v1984_v10 = vor.u32 %v2623_v4, %v1981_v5 }
  0xe2   :  { %1312 = vmatmul.bf16.gmra.mxu1 %v2304_v18 }
  0xe3   :  { %1401 = vmatmul.bf16.gmra.mxu2 %v2308_v22 }
  0xe4   :  { %1490 = vmatmul.bf16.gmra.mxu3 %v2312_v23 }
  0xe6   :  { %v1362_v29 = vpop.f32.mrf.mxu2  ;;  %v1186_v31 = vpop.f32.mrf.mxu0 }
  0xe7   :  { %v3350_v30 = vadd.f32 %v1362_v29, %v1274_v27  ;;  %v1275_v32 = vpop.f32.mrf.mxu1  ;;  %v1187_v34 = vadd.f32 %v3173_v12, %v1186_v31  ;;  %v3532_v4 = vpop.f32.mrf.mxu3 }
  0xe9   :  { %v1276_v36 = vadd.f32 %v1275_v32, %v1187_v34  ;;  %v2383_v32 = vld [vmem:[%s3974_s0 + $0x348] sm:$0xf]  ;;  %v1785_v34 = vld [vmem:[%s3977_s3 + $0x38] sm:$0xff] }
  0xea   :  { %1806 = vmatpush.msrb.mxu3 %v1785_v34  ;;  %v2384_v44 = vor.u32 %v2729_v33, %v2383_v32  ;;  %v2630_v32 = vld [vmem:[%s3974_s0 + $0x4c] sm:$0xf]  ;;  %v2009_v33 = vld [vmem:[%s3974_s0 + $0x64] sm:$0xf0]  ;;  %v2015_v34 = vld [vmem:[%s3974_s0 + $0x50] sm:$0xf] }
  0xee   :  { %v1364_v47 = vpop.f32.mrf.mxu2  ;;  %v1189_v51 = vpop.f32.mrf.mxu0 }
  0xef   :  { %v3383_v50 = vadd.f32 %v1364_v47, %v1276_v36  ;;  %v1278_v52 = vpop.f32.mrf.mxu1  ;;  %v1190_v55 = vadd.f32 %v3173_v12, %v1189_v51  ;;  %v2726_v36 = vld [vmem:[%s3974_s0 + $0x34c] sm:$0xf]  ;;  %v2396_v51 = vor.u32 %v2727_v41, %v2393_v42 }
  0xf0   :  { %v2388_v45 = vor.u32 %v2726_v36, %v2385_v37  ;;  %v2634_v36 = vld [vmem:[%s3974_s0 + $0x68] sm:$0xf0] }
  0xf1   :  { %v1279_v56 = vadd.f32 %v1278_v52, %v1190_v55  ;;  %1228 = vmatmul.bf16.gmra.mxu0 %v2328_v48 }
  0xf2   :  { %1317 = vmatmul.bf16.gmra.mxu1 %v2332_v49  ;;  %v2392_v49 = vor.u32 %v2730_v40, %v2391_v39  ;;  %v2012_v40 = vor.u32 %v2630_v32, %v2009_v33  ;;  %v2644_v32 = vld [vmem:[%s3974_s0 + $0xbc] sm:$0xf]  ;;  %v2065_v33 = vld [vmem:[%s3974_s0 + $0xd4] sm:$0xf0] }
  0xf3   :  { %1406 = vmatmul.bf16.gmra.mxu2 %v2336_v53 }
  0xf4   :  { %1495 = vmatmul.bf16.gmra.mxu3 %v2340_v54 }
  0xf6   :  { %v1367_v58 = vpop.f32.mrf.mxu2  ;;  %v1191_v61 = vpop.f32.mrf.mxu0 }
  0xf7   :  { %v3386_v60 = vadd.f32 %v1367_v58, %v1279_v56  ;;  %v1280_v62 = vpop.f32.mrf.mxu1  ;;  %v1192_v63 = vadd.f32 %v3173_v12, %v1191_v61 }
  0xf9   :  { %v1281_v0 = vadd.f32 %v1280_v62, %v1192_v63  ;;  %v1979_v63 = vld [vmem:[%s3974_s0 + $0x10] sm:$0xf] }
  0xfa   :  { %v1980_v9 = vor.u32 %v2626_v1, %v1979_v63  ;;  %v2037_v63 = vld [vmem:[%s3974_s0 + $0x9c] sm:$0xf0]  ;;  %v2641_v1 = vld [vmem:[%s3974_s0 + $0xa0] sm:$0xf0] }
  0xfe   :  { %v1369_v13 = vpop.f32.mrf.mxu2  ;;  %v1194_v17 = vpop.f32.mrf.mxu0 }
  0xff   :  { %v3416_v16 = vadd.f32 %v1369_v13, %v1281_v0  ;;  %v1283_v18 = vpop.f32.mrf.mxu1  ;;  %v1195_v21 = vadd.f32 %v3173_v12, %v1194_v17  ;;  %v1784_v0 = vld [vmem:[%s3977_s3 + $0x30] sm:$0xff] }
 0x100   :  { %1807 = vmatpush.msrb.mxu3 %v1784_v0  ;;  %v2043_v0 = vld [vmem:[%s3974_s0 + $0x88] sm:$0xf] }
 0x101   :  { %v1284_v22 = vadd.f32 %v1283_v18, %v1195_v21  ;;  %1233 = vmatmul.bf16.gmra.mxu0 %v2356_v14 }
 0x102   :  { %1322 = vmatmul.bf16.gmra.mxu1 %v2360_v15  ;;  %v1988_v15 = vor.u32 %v2627_v7, %v1987_v6 }
 0x103   :  { %1411 = vmatmul.bf16.gmra.mxu2 %v2364_v19 }
 0x104   :  { %1500 = vmatmul.bf16.gmra.mxu3 %v2368_v20 }
 0x106   :  { %v1372_v23 = vpop.f32.mrf.mxu2  ;;  %v1196_v27 = vpop.f32.mrf.mxu0 }
 0x107   :  { %v3419_v24 = vadd.f32 %v1372_v23, %v1284_v22  ;;  %v1285_v28 = vpop.f32.mrf.mxu1  ;;  %v1197_v29 = vadd.f32 %v3173_v12, %v1196_v27 }
 0x109   :  { %v1286_v31 = vadd.f32 %v1285_v28, %v1197_v29  ;;  %v2007_v28 = vld [vmem:[%s3974_s0 + $0x48] sm:$0xf] }
 0x10a   :  { %v1783_v29 = vld [vmem:[%s3977_s3 + $0x28] sm:$0xff] }
 0x10b   :  { %1808 = vmatpush.msrb.mxu3 %v1783_v29  ;;  %v1781_v29 = vld [vmem:[%s3977_s3 + $0x18] sm:$0xff] }
 0x10e   :  { %v1374_v43 = vpop.f32.mrf.mxu2  ;;  %v1199_v47 = vpop.f32.mrf.mxu0 }
 0x10f   :  { %v3449_v46 = vadd.f32 %v1374_v43, %v1286_v31  ;;  %v1288_v48 = vpop.f32.mrf.mxu1  ;;  %v1200_v52 = vadd.f32 %v3173_v12, %v1199_v47  ;;  %v2633_v31 = vld [vmem:[%s3974_s0 + $0x60] sm:$0xf0] }
 0x110   :  { %v2008_v39 = vor.u32 %v2633_v31, %v2007_v28  ;;  %v2063_v28 = vld [vmem:[%s3974_s0 + $0xb8] sm:$0xf]  ;;  %v2647_v31 = vld [vmem:[%s3974_s0 + $0xd0] sm:$0xf0] }
 0x111   :  { %v1289_v53 = vadd.f32 %v1288_v48, %v1200_v52  ;;  %1238 = vmatmul.bf16.gmra.mxu0 %v2384_v44  ;;  %v2016_v44 = vor.u32 %v2634_v36, %v2015_v34  ;;  %v2071_v34 = vld [vmem:[%s3974_s0 + $0xc0] sm:$0xf]  ;;  %v2648_v36 = vld [vmem:[%s3974_s0 + $0xd8] sm:$0xf0] }
 0x112   :  { %1327 = vmatmul.bf16.gmra.mxu1 %v2388_v45 }
 0x113   :  { %1416 = vmatmul.bf16.gmra.mxu2 %v2392_v49 }
 0x114   :  { %1505 = vmatmul.bf16.gmra.mxu3 %v2396_v51 }
 0x116   :  { %v1377_v54 = vpop.f32.mrf.mxu2  ;;  %v1201_v56 = vpop.f32.mrf.mxu0 }
 0x117   :  { %v3452_v55 = vadd.f32 %v1377_v54, %v1289_v53  ;;  %v1290_v58 = vpop.f32.mrf.mxu1  ;;  %v1202_v61 = vadd.f32 %v3173_v12, %v1201_v56  ;;  %v2035_v56 = vld [vmem:[%s3974_s0 + $0x80] sm:$0xf] }
 0x119   :  { %v1291_v62 = vadd.f32 %v1290_v58, %v1202_v61  ;;  %v1782_v58 = vld [vmem:[%s3977_s3 + $0x20] sm:$0xff]  ;;  %v2640_v61 = vld [vmem:[%s3974_s0 + $0x98] sm:$0xf0] }
 0x11a   :  { %1809 = vmatpush.msrb.mxu3 %v1782_v58  ;;  %v2036_v6 = vor.u32 %v2640_v61, %v2035_v56 }
 0x11c   :  { %1810 = vmatpush.msrb.mxu3 %v1781_v29 }
 0x11e   :  { %v1379_v8 = vpop.f32.mrf.mxu2  ;;  %v1204_v13 = vpop.f32.mrf.mxu0 }
 0x11f   :  { %v3476_v11 = vadd.f32 %v1379_v8, %v1291_v62  ;;  %v1293_v14 = vpop.f32.mrf.mxu1  ;;  %v1205_v17 = vadd.f32 %v3173_v12, %v1204_v13  ;;  %v2637_v62 = vld [vmem:[%s3974_s0 + $0x84] sm:$0xf]  ;;  %v2044_v13 = vor.u32 %v2641_v1, %v2043_v0  ;;  %v2654_v0 = vld [vmem:[%s3974_s0 + $0x108] sm:$0xf0]  ;;  %v2651_v1 = vld [vmem:[%s3974_s0 + $0xf4] sm:$0xf] }
 0x120   :  { %v2040_v7 = vor.u32 %v2637_v62, %v2037_v63  ;;  %v2091_v62 = vld [vmem:[%s3974_s0 + $0xf0] sm:$0xf] }
 0x121   :  { %v1294_v18 = vadd.f32 %v1293_v14, %v1205_v17  ;;  %1519 = vmatmul.bf16.vlgmr.msrb.gmra.mxu0 %v1980_v9  ;;  %v1780_v63 = vld [vmem:[%s3977_s3 + $0x10] sm:$0xff] }
 0x122   :  { %1608 = vmatmul.bf16.vlgmr.msrb.gmra.mxu1 %v1984_v10  ;;  %1811 = vmatpush.msrb.mxu3 %v1780_v63 }
 0x123   :  { %2605 = vmatmul.msk.bf16.vlgmr.msrb.gmra.mxu2 %vm1106_vm0, %v1988_v15 }
 0x126   :  { %v1382_v19 = vpop.f32.mrf.mxu2  ;;  %v1206_v21 = vpop.f32.mrf.mxu0 }
 0x127   :  { %v3480_v20 = vadd.f32 %v1382_v19, %v1294_v18  ;;  %v1295_v22 = vpop.f32.mrf.mxu1  ;;  %v1207_v23 = vadd.f32 %v3173_v12, %v1206_v21 }
 0x129   :  { %v1296_v27 = vadd.f32 %v1295_v22, %v1207_v23  ;;  %v3540_v22 = vpop.f32.mrf.mxu3 }
 0x12e   :  { %v1384_v37 = vpop.f32.mrf.mxu2  ;;  %v1209_v42 = vpop.f32.mrf.mxu0 }
 0x12f   :  { %v3504_v41 = vadd.f32 %v1384_v37, %v1296_v27  ;;  %v1298_v43 = vpop.f32.mrf.mxu1  ;;  %v1210_v45 = vadd.f32 %v3173_v12, %v1209_v42 }
 0x131   :  { %v1299_v47 = vadd.f32 %v1298_v43, %v1210_v45  ;;  %1524 = vmatmul.bf16.gmra.mxu0 %v2008_v39  ;;  %v2064_v39 = vor.u32 %v2647_v31, %v2063_v28  ;;  %v2072_v45 = vor.u32 %v2648_v36, %v2071_v34 }
 0x132   :  { %1613 = vmatmul.bf16.gmra.mxu1 %v2012_v40  ;;  %v2068_v40 = vor.u32 %v2644_v32, %v2065_v33 }
 0x133   :  { %2606 = vmatmul.msk.bf16.gmra.mxu2 %vm1106_vm0, %v2016_v44 }
 0x136   :  { %v1387_v48 = vpop.f32.mrf.mxu2  ;;  %v1211_v51 = vpop.f32.mrf.mxu0 }
 0x137   :  { %v3508_v49 = vadd.f32 %v1387_v48, %v1299_v47  ;;  %v1300_v52 = vpop.f32.mrf.mxu1  ;;  %v1212_v53 = vadd.f32 %v3173_v12, %v1211_v51  ;;  %v3567_v48 = vpop.f32.mrf.mxu3 }
 0x139   :  { %v1301_v54 = vadd.f32 %v1300_v52, %v1212_v53 }
 0x13e   :  { %v1389_v5 = vpop.f32.mrf.mxu2  ;;  %v1214_v9 = vpop.f32.mrf.mxu0 }
 0x13f   :  { %v3534_v8 = vadd.f32 %v1389_v5, %v1301_v54  ;;  %v1303_v10 = vpop.f32.mrf.mxu1  ;;  %v1215_v14 = vadd.f32 %v3173_v12, %v1214_v9  ;;  %v2093_v5 = vld [vmem:[%s3974_s0 + $0x10c] sm:$0xf0]  ;;  %v2655_v9 = vld [vmem:[%s3974_s0 + $0x110] sm:$0xf0] }
 0x141   :  { %v1304_v15 = vadd.f32 %v1303_v10, %v1215_v14  ;;  %1529 = vmatmul.bf16.gmra.mxu0 %v2036_v6  ;;  %v3588_v6 = vpop.f32.mrf.mxu3  ;;  %v2096_v14 = vor.u32 %v2651_v1, %v2093_v5 }
 0x142   :  { %1618 = vmatmul.bf16.gmra.mxu1 %v2040_v7  ;;  %v2099_v7 = vld [vmem:[%s3974_s0 + $0xf8] sm:$0xf] }
 0x143   :  { %2607 = vmatmul.msk.bf16.gmra.mxu2 %vm1106_vm0, %v2044_v13  ;;  %v2092_v13 = vor.u32 %v2654_v0, %v2091_v62 }
 0x146   :  { %v1392_v17 = vpop.f32.mrf.mxu2  ;;  %v1216_v19 = vpop.f32.mrf.mxu0 }
 0x147   :  { %v3538_v18 = vadd.f32 %v1392_v17, %v1304_v15  ;;  %v1305_v21 = vpop.f32.mrf.mxu1  ;;  %v1217_v23 = vadd.f32 %v3173_v12, %v1216_v19 }
 0x149   :  { %v1306_v27 = vadd.f32 %v1305_v21, %v1217_v23  ;;  %v2100_v21 = vor.u32 %v2655_v9, %v2099_v7  ;;  %v3600_v28 = vpop.f32.mrf.mxu3 }
 0x14e   :  { %v1394_v37 = vpop.f32.mrf.mxu2  ;;  %v1219_v43 = vpop.f32.mrf.mxu0 }
 0x14f   :  { %v3564_v42 = vadd.f32 %v1394_v37, %v1306_v27  ;;  %v1308_v44 = vpop.f32.mrf.mxu1  ;;  %v1220_v47 = vadd.f32 %v3173_v12, %v1219_v43  ;;  %v2119_v37 = vld [vmem:[%s3974_s0 + $0x128] sm:$0xf]  ;;  %v2658_v43 = vld [vmem:[%s3974_s0 + $0x12c] sm:$0xf] }
 0x151   :  { %v1309_v51 = vadd.f32 %v1308_v44, %v1220_v47  ;;  %1534 = vmatmul.bf16.gmra.mxu0 %v2064_v39  ;;  %v1779_v39 = vld [vmem:[%s3977_s3 + $0x8] sm:$0xff]  ;;  %v3628_v63 = vpop.f32.mrf.mxu3 }
 0x152   :  { %1623 = vmatmul.bf16.gmra.mxu1 %v2068_v40  ;;  %v2661_v40 = vld [vmem:[%s3974_s0 + $0x140] sm:$0xf0]  ;;  %v2121_v44 = vld [vmem:[%s3974_s0 + $0x144] sm:$0xf0]  ;;  %1812 = vmatpush.msrb.mxu3 %v1779_v39  ;;  %v2662_v47 = vld [vmem:[%s3974_s0 + $0x148] sm:$0xf0] }
 0x153   :  { %2608 = vmatmul.msk.bf16.gmra.mxu2 %vm1106_vm0, %v2072_v45  ;;  %v2127_v45 = vld [vmem:[%s3974_s0 + $0x130] sm:$0xf] }
 0x154   :  { %v2128_v62 = vor.u32 %v2662_v47, %v2127_v45 }
 0x156   :  { %v1397_v52 = vpop.f32.mrf.mxu2  ;;  %v1221_v54 = vpop.f32.mrf.mxu0 }
 0x157   :  { %v3570_v53 = vadd.f32 %v1397_v52, %v1309_v51  ;;  %v1310_v56 = vpop.f32.mrf.mxu1  ;;  %v1222_v58 = vadd.f32 %v3173_v12, %v1221_v54  ;;  %v2120_v52 = vor.u32 %v2661_v40, %v2119_v37  ;;  %v2124_v54 = vor.u32 %v2658_v43, %v2121_v44 }
 0x159   :  { %v1311_v61 = vadd.f32 %v1310_v56, %v1222_v58 }
 0x15e   :  { %v1399_v10 = vpop.f32.mrf.mxu2  ;;  %v1224_v17 = vpop.f32.mrf.mxu0 }
 0x15f   :  { %v3596_v15 = vadd.f32 %v1399_v10, %v1311_v61  ;;  %v1313_v19 = vpop.f32.mrf.mxu1  ;;  %v1225_v23 = vadd.f32 %v3173_v12, %v1224_v17 }
 0x161   :  { %v1314_v27 = vadd.f32 %v1313_v19, %v1225_v23  ;;  %1539 = vmatmul.bf16.gmra.mxu0 %v2092_v13  ;;  %v2147_v19 = vld [vmem:[%s3974_s0 + $0x160] sm:$0xf]  ;;  %v2668_v23 = vld [vmem:[%s3974_s0 + $0x178] sm:$0xf0] }
 0x162   :  { %1628 = vmatmul.bf16.gmra.mxu1 %v2096_v14  ;;  %v3635_v14 = vpop.f32.mrf.mxu3 }
 0x163   :  { %2609 = vmatmul.msk.bf16.gmra.mxu2 %vm1106_vm0, %v2100_v21  ;;  %v1778_v21 = vld [vmem:[%s3977_s3] sm:$0xff]  ;;  %s1949_s3 = sshll.u32 %s3979_s5, 4  ;;  %s1950_s3 = int_to_ptr.hbm [resolvable:$true] %s1949_s3 }
 0x164   :  { %1813 = vmatpush.msrb.mxu3 %v1778_v21 }
 0x166   :  { %v1402_v29 = vpop.f32.mrf.mxu2  ;;  %v1226_v32 = vpop.f32.mrf.mxu0 }
 0x167   :  { %v3602_v31 = vadd.f32 %v1402_v29, %v1314_v27  ;;  %v1315_v33 = vpop.f32.mrf.mxu1  ;;  %v1227_v34 = vadd.f32 %v3173_v12, %v1226_v32  ;;  %v2665_v27 = vld [vmem:[%s3974_s0 + $0x164] sm:$0xf]  ;;  %v2149_v29 = vld [vmem:[%s3974_s0 + $0x17c] sm:$0xf0]  ;;  %v2155_v32 = vld [vmem:[%s3974_s0 + $0x168] sm:$0xf] }
 0x168   :  { %v2152_v37 = vor.u32 %v2665_v27, %v2149_v29 }
 0x169   :  { %v1316_v36 = vadd.f32 %v1315_v33, %v1227_v34  ;;  %v2669_v33 = vld [vmem:[%s3974_s0 + $0x180] sm:$0xf0] }
 0x16a   :  { %v2156_v44 = vor.u32 %v2669_v33, %v2155_v32 }
 0x16e   :  { %v1404_v51 = vpop.f32.mrf.mxu2  ;;  %v1229_v58 = vpop.f32.mrf.mxu0 }
 0x16f   :  { %v3626_v56 = vadd.f32 %v1404_v51, %v1316_v36  ;;  %v1318_v61 = vpop.f32.mrf.mxu1  ;;  %v1230_v0 = vadd.f32 %v3173_v12, %v1229_v58  ;;  %v2148_v36 = vor.u32 %v2668_v23, %v2147_v19  ;;  %v3662_v51 = vpop.f32.mrf.mxu3 }
 0x171   :  { %v1319_v1 = vadd.f32 %v1318_v61, %v1230_v0  ;;  %1544 = vmatmul.bf16.gmra.mxu0 %v2120_v52 }
 0x172   :  { %1633 = vmatmul.bf16.gmra.mxu1 %v2124_v54 }
 0x173   :  { %2610 = vmatmul.msk.bf16.gmra.mxu2 %vm1106_vm0, %v2128_v62 }
 0x176   :  { %v1407_v5 = vpop.f32.mrf.mxu2  ;;  %v1231_v9 = vpop.f32.mrf.mxu0 }
 0x177   :  { %v3632_v7 = vadd.f32 %v1407_v5, %v1319_v1  ;;  %v1320_v10 = vpop.f32.mrf.mxu1  ;;  %v1232_v13 = vadd.f32 %v3173_v12, %v1231_v9  ;;  %v2175_v1 = vld [vmem:[%s3974_s0 + $0x198] sm:$0xf]  ;;  %v2675_v5 = vld [vmem:[%s3974_s0 + $0x1b0] sm:$0xf0]  ;;  %v2672_v9 = vld [vmem:[%s3974_s0 + $0x19c] sm:$0xf]  ;;  %v3685_v19 = vpop.f32.mrf.mxu3 }
 0x178   :  { %v2176_v23 = vor.u32 %v2675_v5, %v2175_v1  ;;  %v2205_v1 = vld [vmem:[%s3974_s0 + $0x1ec] sm:$0xf0]  ;;  %v2683_v5 = vld [vmem:[%s3974_s0 + $0x1f0] sm:$0xf0] }
 0x179   :  { %v1321_v17 = vadd.f32 %v1320_v10, %v1232_v13  ;;  %v2177_v10 = vld [vmem:[%s3974_s0 + $0x1b4] sm:$0xf0]  ;;  %v2183_v13 = vld [vmem:[%s3974_s0 + $0x1a0] sm:$0xf] }
 0x17a   :  { %v2180_v27 = vor.u32 %v2672_v9, %v2177_v10 }
 0x17e   :  { %v1409_v34 = vpop.f32.mrf.mxu2  ;;  %v1234_v40 = vpop.f32.mrf.mxu0 }
 0x17f   :  { %v3658_v39 = vadd.f32 %v1409_v34, %v1321_v17  ;;  %v1323_v43 = vpop.f32.mrf.mxu1  ;;  %v1235_v45 = vadd.f32 %v3173_v12, %v1234_v40  ;;  %v2676_v17 = vld [vmem:[%s3974_s0 + $0x1b8] sm:$0xf0] }
 0x180   :  { %v2184_v34 = vor.u32 %v2676_v17, %v2183_v13 }
 0x181   :  { %v1324_v47 = vadd.f32 %v1323_v43, %v1235_v45  ;;  %1549 = vmatmul.bf16.gmra.mxu0 %v2148_v36 }
 0x182   :  { %1638 = vmatmul.bf16.gmra.mxu1 %v2152_v37 }
 0x183   :  { %2611 = vmatmul.msk.bf16.gmra.mxu2 %vm1106_vm0, %v2156_v44 }
 0x186   :  { %v1412_v52 = vpop.f32.mrf.mxu2  ;;  %v1236_v58 = vpop.f32.mrf.mxu0 }
 0x187   :  { %v3664_v54 = vadd.f32 %v1412_v52, %v1324_v47  ;;  %v1325_v61 = vpop.f32.mrf.mxu1  ;;  %v1237_v62 = vadd.f32 %v3173_v12, %v1236_v58  ;;  %v3693_v47 = vpop.f32.mrf.mxu3 }
 0x189   :  { %v1326_v0 = vadd.f32 %v1325_v61, %v1237_v62  ;;  %v2203_v61 = vld [vmem:[%s3974_s0 + $0x1d0] sm:$0xf]  ;;  %v2682_v62 = vld [vmem:[%s3974_s0 + $0x1e8] sm:$0xf0] }
 0x18a   :  { %v2204_v10 = vor.u32 %v2682_v62, %v2203_v61  ;;  %v2233_v61 = vld [vmem:[%s3974_s0 + $0x224] sm:$0xf0] }
 0x18e   :  { %v1414_v21 = vpop.f32.mrf.mxu2  ;;  %v1239_v32 = vpop.f32.mrf.mxu0 }
 0x18f   :  { %v3687_v29 = vadd.f32 %v1414_v21, %v1326_v0  ;;  %v1328_v33 = vpop.f32.mrf.mxu1  ;;  %v1240_v36 = vadd.f32 %v3173_v12, %v1239_v32  ;;  %v2679_v0 = vld [vmem:[%s3974_s0 + $0x1d4] sm:$0xf] }
 0x190   :  { %v2208_v13 = vor.u32 %v2679_v0, %v2205_v1  ;;  %v2690_v0 = vld [vmem:[%s3974_s0 + $0x228] sm:$0xf0] }
 0x191   :  { %v1329_v37 = vadd.f32 %v1328_v33, %v1240_v36  ;;  %1554 = vmatmul.bf16.gmra.mxu0 %v2176_v23  ;;  %v3717_v33 = vpop.f32.mrf.mxu3 }
 0x192   :  { %1643 = vmatmul.bf16.gmra.mxu1 %v2180_v27 }
 0x193   :  { %2612 = vmatmul.msk.bf16.gmra.mxu2 %vm1106_vm0, %v2184_v34 }
 0x196   :  { %v1417_v40 = vpop.f32.mrf.mxu2  ;;  %v1241_v44 = vpop.f32.mrf.mxu0 }
 0x197   :  { %v3691_v43 = vadd.f32 %v1417_v40, %v1329_v37  ;;  %v1330_v45 = vpop.f32.mrf.mxu1  ;;  %v1242_v52 = vadd.f32 %v3173_v12, %v1241_v44  ;;  %v2211_v12 = vld [vmem:[%s3974_s0 + $0x1d8] sm:$0xf] }
 0x198   :  { %v2212_v27 = vor.u32 %v2683_v5, %v2211_v12 }
 0x199   :  { %v1331_v58 = vadd.f32 %v1330_v45, %v1242_v52  ;;  %v2231_v52 = vld [vmem:[%s3974_s0 + $0x208] sm:$0xf]  ;;  %v3733_v62 = vpop.f32.mrf.mxu3 }
 0x19e   :  { %v1419_v9 = vpop.f32.mrf.mxu2  ;;  %v1520_v21 = vpop.f32.mrf.mxu0 }
 0x19f   :  { %v3714_v17 = vadd.f32 %v1419_v9, %v1331_v58  ;;  %v1609_v23 = vpop.f32.mrf.mxu1  ;;  %v1521_v32 = vadd.f32 %v1520_v21, %v3210_v38  ;;  %v2689_v38 = vld [vmem:[%s3974_s0 + $0x220] sm:$0xf0]  ;;  %v2686_v58 = vld [vmem:[%s3974_s0 + $0x20c] sm:$0xf] }
 0x1a0   :  { %v2232_v5 = vor.u32 %v2689_v38, %v2231_v52  ;;  %v2236_v9 = vor.u32 %v2686_v58, %v2233_v61  ;;  %v2259_v52 = vld [vmem:[%s3974_s0 + $0x240] sm:$0xf]  ;;  %v2693_v38 = vld [vmem:[%s3974_s0 + $0x244] sm:$0xf] }
 0x1a1   :  { %1559 = vmatmul.bf16.gmra.mxu0 %v2204_v10  ;;  %v1610_v34 = vadd.f32 %v1609_v23, %v1521_v32  ;;  %v2261_v58 = vld [vmem:[%s3974_s0 + $0x25c] sm:$0xf0]  ;;  %v2697_v61 = vld [vmem:[%s3974_s0 + $0x260] sm:$0xf0] }
 0x1a2   :  { %1648 = vmatmul.bf16.gmra.mxu1 %v2208_v13 }
 0x1a3   :  { %2613 = vmatmul.msk.bf16.gmra.mxu2 %vm1106_vm0, %v2212_v27 }
 0x1a6   :  { %v1698_v36 = vpop.f32.mrf.mxu2  ;;  %v1522_v40 = vpop.f32.mrf.mxu0 }
 0x1a7   :  { %v1699_v37 = vadd.f32 %v1698_v36, %v1610_v34  ;;  %v1611_v44 = vpop.f32.mrf.mxu1  ;;  %v1523_v45 = vadd.f32 %v1522_v40, %v3240_v59  ;;  %v2239_v59 = vld [vmem:[%s3974_s0 + $0x210] sm:$0xf]  ;;  %v3743_v34 = vpop.f32.mrf.mxu3 }
 0x1a8   :  { %v2240_v23 = vor.u32 %v2690_v0, %v2239_v59 }
 0x1a9   :  { %1814 = vmatmul.f32.vlgmr.msrb.gmra.mxu3 %v1699_v37  ;;  %v1612_v1 = vadd.f32 %v1611_v44, %v1523_v45 }
 0x1ae   :  { %v1700_v12 = vpop.f32.mrf.mxu2  ;;  %v1525_v13 = vpop.f32.mrf.mxu0 }
 0x1af   :  { %v1701_v10 = vadd.f32 %v1700_v12, %v1612_v1  ;;  %v1614_v21 = vpop.f32.mrf.mxu1  ;;  %v1526_v27 = vadd.f32 %v1525_v13, %v3243_v3  ;;  %v2696_v3 = vld [vmem:[%s3974_s0 + $0x258] sm:$0xf0]  ;;  %v2264_v12 = vor.u32 %v2693_v38, %v2261_v58  ;;  %v2289_v38 = vld [vmem:[%s3974_s0 + $0x294] sm:$0xf0] }
 0x1b0   :  { %v2260_v1 = vor.u32 %v2696_v3, %v2259_v52  ;;  %v2287_v52 = vld [vmem:[%s3974_s0 + $0x278] sm:$0xf]  ;;  %v2700_v3 = vld [vmem:[%s3974_s0 + $0x27c] sm:$0xf] }
 0x1b1   :  { %1817 = vmatmul.f32.gmra.mxu3 %v1701_v10  ;;  %1564 = vmatmul.bf16.gmra.mxu0 %v2232_v5  ;;  %v1615_v32 = vadd.f32 %v1614_v21, %v1526_v27  ;;  %v3764_v21 = vpop.f32.mrf.mxu3  ;;  %v2704_v58 = vld [vmem:[%s3974_s0 + $0x298] sm:$0xf0] }
 0x1b2   :  { %1653 = vmatmul.bf16.gmra.mxu1 %v2236_v9 }
 0x1b3   :  { %2614 = vmatmul.msk.bf16.gmra.mxu2 %vm1106_vm0, %v2240_v23 }
 0x1b6   :  { %v1703_v36 = vpop.f32.mrf.mxu2  ;;  %v1527_v40 = vpop.f32.mrf.mxu0 }
 0x1b7   :  { %v1704_v37 = vadd.f32 %v1703_v36, %v1615_v32  ;;  %v1616_v44 = vpop.f32.mrf.mxu1  ;;  %v1528_v45 = vadd.f32 %v1527_v40, %v3273_v25  ;;  %v2267_v25 = vld [vmem:[%s3974_s0 + $0x248] sm:$0xf] }
 0x1b8   :  { %v2268_v13 = vor.u32 %v2697_v61, %v2267_v25 }
 0x1b9   :  { %1820 = vmatmul.f32.gmra.mxu3 %v1704_v37  ;;  %v1617_v59 = vadd.f32 %v1616_v44, %v1528_v45  ;;  %v3769_v45 = vpop.f32.mrf.mxu3 }
 0x1be   :  { %v1705_v0 = vpop.f32.mrf.mxu2  ;;  %v1530_v9 = vpop.f32.mrf.mxu0 }
 0x1bf   :  { %v1706_v5 = vadd.f32 %v1705_v0, %v1617_v59  ;;  %v1619_v10 = vpop.f32.mrf.mxu1  ;;  %v1531_v23 = vadd.f32 %v1530_v9, %v3282_v35  ;;  %v2703_v35 = vld [vmem:[%s3974_s0 + $0x290] sm:$0xf0]  ;;  %v2292_v0 = vor.u32 %v2700_v3, %v2289_v38 }
 0x1c0   :  { %v2288_v59 = vor.u32 %v2703_v35, %v2287_v52  ;;  %v2707_v52 = vld [vmem:[%s3974_s0 + $0x2b4] sm:$0xf]  ;;  %v2317_v35 = vld [vmem:[%s3974_s0 + $0x2cc] sm:$0xf0] }
 0x1c1   :  { %1823 = vmatmul.f32.gmra.mxu3 %v1706_v5  ;;  %1569 = vmatmul.bf16.gmra.mxu0 %v2260_v1  ;;  %v1620_v27 = vadd.f32 %v1619_v10, %v1531_v23  ;;  %v2711_v3 = vld [vmem:[%s3974_s0 + $0x2d0] sm:$0xf0] }
 0x1c2   :  { %1658 = vmatmul.bf16.gmra.mxu1 %v2264_v12 }
 0x1c3   :  { %2615 = vmatmul.msk.bf16.gmra.mxu2 %vm1106_vm0, %v2268_v13  ;;  %v3791_v13 = vpop.f32.mrf.mxu3 }
 0x1c6   :  { %v1708_v32 = vpop.f32.mrf.mxu2  ;;  %v1532_v37 = vpop.f32.mrf.mxu0 }
 0x1c7   :  { %v1709_v36 = vadd.f32 %v1708_v32, %v1620_v27  ;;  %v1621_v40 = vpop.f32.mrf.mxu1  ;;  %v1533_v44 = vadd.f32 %v1532_v37, %v3312_v57  ;;  %v2295_v57 = vld [vmem:[%s3974_s0 + $0x280] sm:$0xf] }
 0x1c8   :  { %v2296_v9 = vor.u32 %v2704_v58, %v2295_v57 }
 0x1c9   :  { %1826 = vmatmul.f32.gmra.mxu3 %v1709_v36  ;;  %v1622_v25 = vadd.f32 %v1621_v40, %v1533_v44  ;;  %v2315_v44 = vld [vmem:[%s3974_s0 + $0x2b0] sm:$0xf] }
 0x1cb   :  { %v3812_v57 = vpop.f32.mrf.mxu3 }
 0x1ce   :  { %v1710_v61 = vpop.f32.mrf.mxu2  ;;  %v1535_v12 = vpop.f32.mrf.mxu0 }
 0x1cf   :  { %v1711_v1 = vadd.f32 %v1710_v61, %v1622_v25  ;;  %v1624_v5 = vpop.f32.mrf.mxu1  ;;  %v1536_v10 = vadd.f32 %v1535_v12, %v3315_v2  ;;  %v2710_v2 = vld [vmem:[%s3974_s0 + $0x2c8] sm:$0xf0]  ;;  %v2320_v61 = vor.u32 %v2707_v52, %v2317_v35 }
 0x1d0   :  { %v2316_v25 = vor.u32 %v2710_v2, %v2315_v44  ;;  %v2717_v44 = vld [vmem:[%s3974_s0 + $0x300] sm:$0xf0]  ;;  %v2714_v2 = vld [vmem:[%s3974_s0 + $0x2ec] sm:$0xf] }
 0x1d1   :  { %1829 = vmatmul.f32.gmra.mxu3 %v1711_v1  ;;  %1574 = vmatmul.bf16.gmra.mxu0 %v2288_v59  ;;  %v1625_v23 = vadd.f32 %v1624_v5, %v1536_v10  ;;  %v1452_v59 = vadd.f32 %v3532_v4, %v3350_v30  ;;  %v2343_v4 = vld [vmem:[%s3974_s0 + $0x2e8] sm:$0xf]  ;;  %v2718_v52 = vld [vmem:[%s3974_s0 + $0x308] sm:$0xf0] }
 0x1d2   :  { %1663 = vmatmul.bf16.gmra.mxu1 %v2292_v0 }
 0x1d3   :  { %2616 = vmatmul.msk.bf16.gmra.mxu2 %vm1106_vm0, %v2296_v9 }
 0x1d6   :  { %v1713_v27 = vpop.f32.mrf.mxu2  ;;  %v1537_v36 = vpop.f32.mrf.mxu0 }
 0x1d7   :  { %v1714_v32 = vadd.f32 %v1713_v27, %v1625_v23  ;;  %v1626_v37 = vpop.f32.mrf.mxu1  ;;  %v1538_v40 = vadd.f32 %v1537_v36, %v3345_v26  ;;  %v2323_v26 = vld [vmem:[%s3974_s0 + $0x2b8] sm:$0xf]  ;;  %v1454_v27 = vadd.f32 %v3540_v22, %v3383_v50  ;;  %v2345_v50 = vld [vmem:[%s3974_s0 + $0x304] sm:$0xf0]  ;;  %v2351_v22 = vld [vmem:[%s3974_s0 + $0x2f0] sm:$0xf] }
 0x1d8   :  { %v2324_v5 = vor.u32 %v2711_v3, %v2323_v26  ;;  %v2344_v3 = vor.u32 %v2717_v44, %v2343_v4  ;;  %v2725_v4 = vld [vmem:[%s3974_s0 + $0x340] sm:$0xf0] }
 0x1d9   :  { %1832 = vmatmul.f32.gmra.mxu3 %v1714_v32  ;;  %v1627_v38 = vadd.f32 %v1626_v37, %v1538_v40  ;;  %v3819_v40 = vpop.f32.mrf.mxu3 }
 0x1de   :  { %v1715_v58 = vpop.f32.mrf.mxu2  ;;  %v1540_v1 = vpop.f32.mrf.mxu0 }
 0x1df   :  { %v1716_v0 = vadd.f32 %v1715_v58, %v1627_v38  ;;  %v1629_v12 = vpop.f32.mrf.mxu1  ;;  %v1541_v9 = vadd.f32 %v1540_v1, %v1452_v59  ;;  %v2348_v38 = vor.u32 %v2714_v2, %v2345_v50  ;;  %v1457_v58 = vadd.f32 %v3567_v48, %v3386_v60 }
 0x1e1   :  { %1835 = vmatmul.f32.gmra.mxu3 %v1716_v0  ;;  %1579 = vmatmul.bf16.gmra.mxu0 %v2316_v25  ;;  %v1630_v10 = vadd.f32 %v1629_v12, %v1541_v9  ;;  %v2352_v0 = vor.u32 %v2718_v52, %v2351_v22  ;;  %v3841_v12 = vpop.f32.mrf.mxu3  ;;  %v1462_v52 = vadd.f32 %v3600_v28, %v3419_v24 }
 0x1e2   :  { %1668 = vmatmul.bf16.gmra.mxu1 %v2320_v61 }
 0x1e3   :  { %2617 = vmatmul.msk.bf16.gmra.mxu2 %vm1106_vm0, %v2324_v5 }
 0x1e6   :  { %v1718_v23 = vpop.f32.mrf.mxu2  ;;  %v1542_v36 = vpop.f32.mrf.mxu0 }
 0x1e7   :  { %v1719_v32 = vadd.f32 %v1718_v23, %v1630_v10  ;;  %v1631_v37 = vpop.f32.mrf.mxu1  ;;  %v1543_v30 = vadd.f32 %v1542_v36, %v1454_v27  ;;  %v1459_v10 = vadd.f32 %v3588_v6, %v3416_v16  ;;  %v2724_v36 = vld [vmem:[%s3974_s0 + $0x338] sm:$0xf0]  ;;  %v2373_v16 = vld [vmem:[%s3974_s0 + $0x33c] sm:$0xf0] }
 0x1e9   :  { %1838 = vmatmul.f32.gmra.mxu3 %v1719_v32  ;;  %v1632_v35 = vadd.f32 %v1631_v37, %v1543_v30  ;;  %v2371_v32 = vld [vmem:[%s3974_s0 + $0x320] sm:$0xf]  ;;  %v2721_v37 = vld [vmem:[%s3974_s0 + $0x324] sm:$0xf]  ;;  %v3858_v6 = vpop.f32.mrf.mxu3  ;;  %v2379_v30 = vld [vmem:[%s3974_s0 + $0x328] sm:$0xf] }
 0x1ea   :  { %v2372_v50 = vor.u32 %v2724_v36, %v2371_v32  ;;  %v2376_v22 = vor.u32 %v2721_v37, %v2373_v16  ;;  %v1467_v37 = vadd.f32 %v3635_v14, %v3452_v55 }
 0x1ee   :  { %v1720_v26 = vpop.f32.mrf.mxu2  ;;  %v1545_v61 = vpop.f32.mrf.mxu0 }
 0x1ef   :  { %v1721_v25 = vadd.f32 %v1720_v26, %v1632_v35  ;;  %v1634_v59 = vpop.f32.mrf.mxu1  ;;  %v1546_v1 = vadd.f32 %v1545_v61, %v1457_v58 }
 0x1f1   :  { %1841 = vmatmul.f32.gmra.mxu3 %v1721_v25  ;;  %1584 = vmatmul.bf16.gmra.mxu0 %v2344_v3  ;;  %v1635_v5 = vadd.f32 %v1634_v59, %v1546_v1  ;;  %v3869_v61 = vpop.f32.mrf.mxu3 }
 0x1f2   :  { %1673 = vmatmul.bf16.gmra.mxu1 %v2348_v38  ;;  %v2380_v38 = vor.u32 %v2725_v4, %v2379_v30 }
 0x1f3   :  { %2618 = vmatmul.msk.bf16.gmra.mxu2 %vm1106_vm0, %v2352_v0  ;;  %v1464_v0 = vadd.f32 %v3628_v63, %v3449_v46  ;;  %v2401_v46 = vld [vmem:[%s3974_s0 + $0x374] sm:$0xf0]  ;;  %v2407_v63 = vld [vmem:[%s3974_s0 + $0x360] sm:$0xf] }
 0x1f6   :  { %v1723_v9 = vpop.f32.mrf.mxu2  ;;  %v1547_v27 = vpop.f32.mrf.mxu0 }
 0x1f7   :  { %v1724_v23 = vadd.f32 %v1723_v9, %v1635_v5  ;;  %v1636_v60 = vpop.f32.mrf.mxu1  ;;  %v1548_v48 = vadd.f32 %v1547_v27, %v1459_v10  ;;  %v2399_v9 = vld [vmem:[%s3974_s0 + $0x358] sm:$0xf]  ;;  %v2731_v10 = vld [vmem:[%s3974_s0 + $0x370] sm:$0xf0]  ;;  %v2732_v27 = vld [vmem:[%s3974_s0 + $0x378] sm:$0xf0] }
 0x1f8   :  { %v2400_v32 = vor.u32 %v2731_v10, %v2399_v9  ;;  %v1474_v9 = vadd.f32 %v3693_v47, %v3504_v41 }
 0x1f9   :  { %1844 = vmatmul.f32.gmra.mxu3 %v1724_v23  ;;  %v1637_v44 = vadd.f32 %v1636_v60, %v1548_v48  ;;  %v2728_v23 = vld [vmem:[%s3974_s0 + $0x35c] sm:$0xf] }
 0x1fa   :  { %v2404_v36 = vor.u32 %v2728_v23, %v2401_v46 }
 0x1fe   :  { %v1725_v2 = vpop.f32.mrf.mxu2  ;;  %v1550_v26 = vpop.f32.mrf.mxu0 }
 0x1ff   :  { %v1726_v35 = vadd.f32 %v1725_v2, %v1637_v44  ;;  %v1639_v3 = vpop.f32.mrf.mxu1  ;;  %v1551_v58 = vadd.f32 %v1550_v26, %v1462_v52  ;;  %v2408_v44 = vor.u32 %v2732_v27, %v2407_v63  ;;  %v3893_v2 = vpop.f32.mrf.mxu3 }
 0x201   :  { %1847 = vmatmul.f32.gmra.mxu3 %v1726_v35  ;;  %1589 = vmatmul.bf16.gmra.mxu0 %v2372_v50  ;;  %v1640_v25 = vadd.f32 %v1639_v3, %v1551_v58  ;;  %v1469_v35 = vadd.f32 %v3662_v51, %v3476_v11 }
 0x202   :  { %1678 = vmatmul.bf16.gmra.mxu1 %v2376_v22 }
 0x203   :  { %2619 = vmatmul.msk.bf16.gmra.mxu2 %vm1106_vm0, %v2380_v38 }
 0x206   :  { %v1728_v59 = vpop.f32.mrf.mxu2  ;;  %v1552_v5 = vpop.f32.mrf.mxu0 }
 0x207   :  { %v1729_v1 = vadd.f32 %v1728_v59, %v1640_v25  ;;  %v1641_v24 = vpop.f32.mrf.mxu1  ;;  %v1553_v28 = vadd.f32 %v1552_v5, %v1464_v0  ;;  %v3898_v38 = vpop.f32.mrf.mxu3  ;;  %v1472_v59 = vadd.f32 %v3685_v19, %v3480_v20  ;;  %v3909_v20 = vld [vmem:[%s3978_s4] ss:$0 sm:$0xff]  ;;  %s2813_s4 = smov [#allocation2]  }
 0x208   :  { %s1947_s21 = sshll.u32 %s2813_s4, 4  ;;  %s1948_s21 = int_to_ptr.vmem [resolvable:$true] %s1947_s21 }
 0x209   :  { %1850 = vmatmul.f32.gmra.mxu3 %v1729_v1  ;;  %v1642_v60 = vadd.f32 %v1641_v24, %v1553_v28 }
 0x20e   :  { %v1730_v48 = vpop.f32.mrf.mxu2  ;;  %v1555_v30 = vpop.f32.mrf.mxu0 }
 0x20f   :  { %v1731_v16 = vadd.f32 %v1730_v48, %v1642_v60  ;;  %v1644_v4 = vpop.f32.mrf.mxu1  ;;  %v1556_v50 = vadd.f32 %v1555_v30, %v1467_v37  ;;  %v3902_v28 = vpop.f32.mrf.mxu3 }
 0x211   :  { %1853 = vmatmul.f32.gmra.mxu3 %v1731_v16  ;;  %1594 = vmatmul.bf16.gmra.mxu0 %v2400_v32  ;;  %v1645_v22 = vadd.f32 %v1644_v4, %v1556_v50  ;;  %v1477_v32 = vadd.f32 %v3717_v33, %v3508_v49  ;;  %v1479_v50 = vadd.f32 %v3733_v62, %v3534_v8 }
 0x212   :  { %1683 = vmatmul.bf16.gmra.mxu1 %v2404_v36 }
 0x213   :  { %2620 = vmatmul.msk.bf16.gmra.mxu2 %vm1106_vm0, %v2408_v44 }
 0x216   :  { %v1733_v52 = vpop.f32.mrf.mxu2  ;;  %v1557_v3 = vpop.f32.mrf.mxu0 }
 0x217   :  { %v1734_v26 = vadd.f32 %v1733_v52, %v1645_v22  ;;  %v1646_v55 = vpop.f32.mrf.mxu1  ;;  %v1558_v14 = vadd.f32 %v1557_v3, %v1469_v35 }
 0x219   :  { %1856 = vmatmul.f32.gmra.mxu3 %v1734_v26  ;;  %v1647_v58 = vadd.f32 %v1646_v55, %v1558_v14  ;;  %v1482_v14 = vadd.f32 %v3743_v34, %v3538_v18 }
 0x21e   :  { %v1735_v25 = vpop.f32.mrf.mxu2  ;;  %v1560_v1 = vpop.f32.mrf.mxu0 }
 0x21f   :  { %v1736_v0 = vadd.f32 %v1735_v25, %v1647_v58  ;;  %v1649_v5 = vpop.f32.mrf.mxu1  ;;  %v1561_v24 = vadd.f32 %v1560_v1, %v1472_v59 }
 0x221   :  { %1859 = vmatmul.f32.gmra.mxu3 %v1736_v0  ;;  %v1650_v11 = vadd.f32 %v1649_v5, %v1561_v24  ;;  %v1484_v24 = vadd.f32 %v3764_v21, %v3564_v42 }
 0x226   :  { %v1738_v51 = vpop.f32.mrf.mxu2  ;;  %v1562_v23 = vpop.f32.mrf.mxu0 }
 0x227   :  { %v1739_v10 = vadd.f32 %v1738_v51, %v1650_v11  ;;  %v1651_v46 = vpop.f32.mrf.mxu1  ;;  %v1563_v63 = vadd.f32 %v1562_v23, %v1474_v9 }
 0x229   :  { %1862 = vmatmul.f32.gmra.mxu3 %v1739_v10  ;;  %v1652_v27 = vadd.f32 %v1651_v46, %v1563_v63  ;;  %v1487_v63 = vadd.f32 %v3769_v45, %v3570_v53 }
 0x22c   :  { %v1815_v19 = vpop.f32.mrf.mxu3 }
 0x22d   :  { %v1816_v60 = vadd.f32 %v3909_v20, %v1815_v19 }
 0x22e   :  { %v1740_v48 = vpop.f32.mrf.mxu2  ;;  %v1565_v47 = vpop.f32.mrf.mxu0 }
 0x22f   :  { %1911 = vst [vmem:[#allocation2] sm:$0xff] %v1816_v60  ;;  %v1741_v41 = vadd.f32 %v1740_v48, %v1652_v27  ;;  %v1654_v36 = vpop.f32.mrf.mxu1  ;;  %v1566_v37 = vadd.f32 %v1565_v47, %v1477_v32  ;;  %v1489_v47 = vadd.f32 %v3791_v13, %v3596_v15 }
 0x231   :  { %1865 = vmatmul.f32.gmra.mxu3 %v1741_v41  ;;  %v1655_v30 = vadd.f32 %v1654_v36, %v1566_v37 }
 0x234   :  { %v1818_v16 = vpop.f32.mrf.mxu3 }
 0x235   :  { %v1819_v4 = vadd.f32 %v3909_v20, %v1818_v16 }
 0x236   :  { %v1743_v44 = vpop.f32.mrf.mxu2  ;;  %v1567_v52 = vpop.f32.mrf.mxu0 }
 0x237   :  { %1912 = vst [vmem:[#allocation2 + $0x8] sm:$0xff] %v1819_v4  ;;  %v1744_v22 = vadd.f32 %v1743_v44, %v1655_v30  ;;  %v1656_v35 = vpop.f32.mrf.mxu1  ;;  %v1568_v26 = vadd.f32 %v1567_v52, %v1479_v50  ;;  %v1492_v50 = vadd.f32 %v3812_v57, %v3602_v31 }
 0x239   :  { %1868 = vmatmul.f32.gmra.mxu3 %v1744_v22  ;;  %v1657_v33 = vadd.f32 %v1656_v35, %v1568_v26 }
 0x23c   :  { %v1821_v49 = vpop.f32.mrf.mxu3 }
 0x23d   :  { %v1822_v3 = vadd.f32 %v3909_v20, %v1821_v49 }
 0x23e   :  { %v1745_v55 = vpop.f32.mrf.mxu2  ;;  %v1570_v25 = vpop.f32.mrf.mxu0 }
 0x23f   :  { %1913 = vst [vmem:[#allocation2 + $0x10] sm:$0xff] %v1822_v3  ;;  %v1746_v58 = vadd.f32 %v1745_v55, %v1657_v33  ;;  %v1659_v59 = vpop.f32.mrf.mxu1  ;;  %v1571_v0 = vadd.f32 %v1570_v25, %v1482_v14  ;;  %v1494_v3 = vadd.f32 %v3819_v40, %v3626_v56 }
 0x241   :  { %1871 = vmatmul.f32.gmra.mxu3 %v1746_v58  ;;  %v1660_v62 = vadd.f32 %v1659_v59, %v1571_v0 }
 0x244   :  { %v1824_v8 = vpop.f32.mrf.mxu3 }
 0x245   :  { %v1825_v1 = vadd.f32 %v3909_v20, %v1824_v8  ;;  %v1497_v8 = vadd.f32 %v3841_v12, %v3632_v7 }
 0x246   :  { %v1748_v5 = vpop.f32.mrf.mxu2  ;;  %v1572_v51 = vpop.f32.mrf.mxu0 }
 0x247   :  { %1914 = vst [vmem:[#allocation2 + $0x18] sm:$0xff] %v1825_v1  ;;  %v1749_v11 = vadd.f32 %v1748_v5, %v1660_v62  ;;  %v1661_v9 = vpop.f32.mrf.mxu1  ;;  %v1573_v10 = vadd.f32 %v1572_v51, %v1484_v24 }
 0x249   :  { %1874 = vmatmul.f32.gmra.mxu3 %v1749_v11  ;;  %v1662_v34 = vadd.f32 %v1661_v9, %v1573_v10  ;;  %v1499_v9 = vadd.f32 %v3858_v6, %v3658_v39 }
 0x24c   :  { %v1827_v18 = vpop.f32.mrf.mxu3 }
 0x24d   :  { %v1828_v23 = vadd.f32 %v3909_v20, %v1827_v18 }
 0x24e   :  { %v1750_v46 = vpop.f32.mrf.mxu2  ;;  %v1575_v27 = vpop.f32.mrf.mxu0 }
 0x24f   :  { %1915 = vst [vmem:[#allocation2 + $0x20] sm:$0xff] %v1828_v23  ;;  %v1751_v19 = vadd.f32 %v1750_v46, %v1662_v34  ;;  %v1664_v60 = vpop.f32.mrf.mxu1  ;;  %v1576_v48 = vadd.f32 %v1575_v27, %v1487_v63 }
 0x251   :  { %1877 = vmatmul.f32.gmra.mxu3 %v1751_v19  ;;  %v1665_v21 = vadd.f32 %v1664_v60, %v1576_v48  ;;  %v1502_v19 = vadd.f32 %v3869_v61, %v3664_v54 }
 0x254   :  { %v1830_v42 = vpop.f32.mrf.mxu3 }
 0x255   :  { %v1831_v32 = vadd.f32 %v3909_v20, %v1830_v42 }
 0x256   :  { %v1753_v41 = vpop.f32.mrf.mxu2  ;;  %v1577_v37 = vpop.f32.mrf.mxu0 }
 0x257   :  { %1916 = vst [vmem:[#allocation2 + $0x28] sm:$0xff] %v1831_v32  ;;  %v1754_v36 = vadd.f32 %v1753_v41, %v1665_v21  ;;  %v1666_v16 = vpop.f32.mrf.mxu1  ;;  %v1578_v30 = vadd.f32 %v1577_v37, %v1489_v47  ;;  %v1504_v41 = vadd.f32 %v3893_v2, %v3687_v29 }
 0x259   :  { %1880 = vmatmul.f32.gmra.mxu3 %v1754_v36  ;;  %v1667_v45 = vadd.f32 %v1666_v16, %v1578_v30 }
 0x25c   :  { %v1833_v53 = vpop.f32.mrf.mxu3 }
 0x25d   :  { %v1834_v4 = vadd.f32 %v3909_v20, %v1833_v53 }
 0x25e   :  { %v1755_v44 = vpop.f32.mrf.mxu2  ;;  %v1580_v52 = vpop.f32.mrf.mxu0 }
 0x25f   :  { %1917 = vst [vmem:[#allocation2 + $0x30] sm:$0xff] %v1834_v4  ;;  %v1756_v22 = vadd.f32 %v1755_v44, %v1667_v45  ;;  %v1669_v35 = vpop.f32.mrf.mxu1  ;;  %v1581_v26 = vadd.f32 %v1580_v52, %v1492_v50  ;;  %v1507_v45 = vadd.f32 %v3898_v38, %v3691_v43 }
 0x261   :  { %1883 = vmatmul.f32.gmra.mxu3 %v1756_v22  ;;  %v1670_v13 = vadd.f32 %v1669_v35, %v1581_v26  ;;  %v1509_v26 = vadd.f32 %v3902_v28, %v3714_v17 }
 0x264   :  { %v1836_v15 = vpop.f32.mrf.mxu3 }
 0x265   :  { %v1837_v49 = vadd.f32 %v3909_v20, %v1836_v15 }
 0x266   :  { %v1758_v33 = vpop.f32.mrf.mxu2  ;;  %v1582_v14 = vpop.f32.mrf.mxu0 }
 0x267   :  { %1918 = vst [vmem:[#allocation2 + $0x38] sm:$0xff] %v1837_v49  ;;  %v1759_v55 = vadd.f32 %v1758_v33, %v1670_v13  ;;  %v1671_v58 = vpop.f32.mrf.mxu1  ;;  %v1583_v25 = vadd.f32 %v1582_v14, %v1494_v3 }
 0x269   :  { %1886 = vmatmul.f32.gmra.mxu3 %v1759_v55  ;;  %v1672_v57 = vadd.f32 %v1671_v58, %v1583_v25 }
 0x26c   :  { %v1839_v31 = vpop.f32.mrf.mxu3 }
 0x26d   :  { %v1840_v59 = vadd.f32 %v3909_v20, %v1839_v31 }
 0x26e   :  { %v1760_v0 = vpop.f32.mrf.mxu2  ;;  %v1585_v1 = vpop.f32.mrf.mxu0 }
 0x26f   :  { %1919 = vst [vmem:[#allocation2 + $0x40] sm:$0xff] %v1840_v59  ;;  %v1761_v62 = vadd.f32 %v1760_v0, %v1672_v57  ;;  %v1674_v5 = vpop.f32.mrf.mxu1  ;;  %v1586_v24 = vadd.f32 %v1585_v1, %v1497_v8 }
 0x271   :  { %1889 = vmatmul.f32.gmra.mxu3 %v1761_v62  ;;  %v1675_v40 = vadd.f32 %v1674_v5, %v1586_v24 }
 0x274   :  { %v1842_v56 = vpop.f32.mrf.mxu3 }
 0x275   :  { %v1843_v11 = vadd.f32 %v3909_v20, %v1842_v56 }
 0x276   :  { %v1763_v51 = vpop.f32.mrf.mxu2  ;;  %v1587_v18 = vpop.f32.mrf.mxu0 }
 0x277   :  { %1920 = vst [vmem:[#allocation2 + $0x48] sm:$0xff] %v1843_v11  ;;  %v1764_v10 = vadd.f32 %v1763_v51, %v1675_v40  ;;  %v1676_v34 = vpop.f32.mrf.mxu1  ;;  %v1588_v23 = vadd.f32 %v1587_v18, %v1499_v9 }
 0x279   :  { %1892 = vmatmul.f32.gmra.mxu3 %v1764_v10  ;;  %v1677_v12 = vadd.f32 %v1676_v34, %v1588_v23 }
 0x27c   :  { %v1845_v7 = vpop.f32.mrf.mxu3 }
 0x27d   :  { %v1846_v46 = vadd.f32 %v3909_v20, %v1845_v7 }
 0x27e   :  { %v1765_v63 = vpop.f32.mrf.mxu2  ;;  %v1590_v60 = vpop.f32.mrf.mxu0 }
 0x27f   :  { %1921 = vst [vmem:[#allocation2 + $0x50] sm:$0xff] %v1846_v46  ;;  %v1766_v27 = vadd.f32 %v1765_v63, %v1677_v12  ;;  %v1679_v48 = vpop.f32.mrf.mxu1  ;;  %v1591_v42 = vadd.f32 %v1590_v60, %v1502_v19 }
 0x281   :  { %1895 = vmatmul.f32.gmra.mxu3 %v1766_v27  ;;  %v1680_v6 = vadd.f32 %v1679_v48, %v1591_v42 }
 0x284   :  { %v1848_v39 = vpop.f32.mrf.mxu3 }
 0x285   :  { %v1849_v21 = vadd.f32 %v3909_v20, %v1848_v39 }
 0x286   :  { %v1768_v32 = vpop.f32.mrf.mxu2  ;;  %v1592_v36 = vpop.f32.mrf.mxu0 }
 0x287   :  { %1922 = vst [vmem:[#allocation2 + $0x58] sm:$0xff] %v1849_v21  ;;  %v1769_v47 = vadd.f32 %v1768_v32, %v1680_v6  ;;  %v1681_v37 = vpop.f32.mrf.mxu1  ;;  %v1593_v16 = vadd.f32 %v1592_v36, %v1504_v41 }
 0x289   :  { %1898 = vmatmul.f32.gmra.mxu3 %v1769_v47  ;;  %v1682_v61 = vadd.f32 %v1681_v37, %v1593_v16 }
 0x28c   :  { %v1851_v54 = vpop.f32.mrf.mxu3 }
 0x28d   :  { %v1852_v30 = vadd.f32 %v3909_v20, %v1851_v54 }
 0x28e   :  { %v1770_v53 = vpop.f32.mrf.mxu2  ;;  %v1595_v44 = vpop.f32.mrf.mxu0 }
 0x28f   :  { %1923 = vst [vmem:[#allocation2 + $0x60] sm:$0xff] %v1852_v30  ;;  %v1771_v4 = vadd.f32 %v1770_v53, %v1682_v61  ;;  %v1596_v50 = vadd.f32 %v1595_v44, %v1507_v45  ;;  %v1684_v29 = vpop.f32.mrf.mxu1 }
 0x291   :  { %1901 = vmatmul.f32.gmra.mxu3 %v1771_v4  ;;  %v1685_v22 = vadd.f32 %v1684_v29, %v1596_v50 }
 0x294   :  { %v1854_v2 = vpop.f32.mrf.mxu3 }
 0x295   :  { %v1855_v52 = vadd.f32 %v3909_v20, %v1854_v2 }
 0x296   :  { %v1773_v35 = vpop.f32.mrf.mxu2  ;;  %v1597_v13 = vpop.f32.mrf.mxu0 }
 0x297   :  { %1924 = vst [vmem:[#allocation2 + $0x68] sm:$0xff] %v1855_v52  ;;  %v1774_v15 = vadd.f32 %v1773_v35, %v1685_v22  ;;  %v1598_v49 = vadd.f32 %v1597_v13, %v1509_v26  ;;  %v1686_v43 = vpop.f32.mrf.mxu1 }
 0x299   :  { %1904 = vmatmul.f32.gmra.mxu3 %v1774_v15  ;;  %v1687_v33 = vadd.f32 %v1686_v43, %v1598_v49 }
 0x29c   :  { %v1857_v38 = vpop.f32.mrf.mxu3 }
 0x29d   :  { %v1858_v3 = vadd.f32 %v3909_v20, %v1857_v38 }
 0x29e   :  { %v1775_v55 = vpop.f32.mrf.mxu2 }
 0x29f   :  { %1925 = vst [vmem:[#allocation2 + $0x70] sm:$0xff] %v1858_v3  ;;  %v1776_v14 = vadd.f32 %v1775_v55, %v1687_v33 }
 0x2a1   :  { %1907 = vmatmul.f32.gmra.mxu3 %v1776_v14 }
 0x2a4   :  { %v1860_v58 = vpop.f32.mrf.mxu3 }
 0x2a5   :  { %v1861_v25 = vadd.f32 %v3909_v20, %v1860_v58 }
 0x2a7   :  { %1926 = vst [vmem:[#allocation2 + $0x78] sm:$0xff] %v1861_v25 }
 0x2ac   :  { %v1863_v31 = vpop.f32.mrf.mxu3 }
 0x2ad   :  { %v1864_v17 = vadd.f32 %v3909_v20, %v1863_v31 }
 0x2af   :  { %1927 = vst [vmem:[#allocation2 + $0x80] sm:$0xff] %v1864_v17 }
 0x2b4   :  { %v1866_v28 = vpop.f32.mrf.mxu3 }
 0x2b5   :  { %v1867_v57 = vadd.f32 %v3909_v20, %v1866_v28 }
 0x2b7   :  { %1928 = vst [vmem:[#allocation2 + $0x88] sm:$0xff] %v1867_v57 }
 0x2bc   :  { %v1869_v59 = vpop.f32.mrf.mxu3 }
 0x2bd   :  { %v1870_v0 = vadd.f32 %v3909_v20, %v1869_v59 }
 0x2bf   :  { %1929 = vst [vmem:[#allocation2 + $0x90] sm:$0xff] %v1870_v0 }
 0x2c4   :  { %v1872_v8 = vpop.f32.mrf.mxu3 }
 0x2c5   :  { %v1873_v62 = vadd.f32 %v3909_v20, %v1872_v8 }
 0x2c7   :  { %1930 = vst [vmem:[#allocation2 + $0x98] sm:$0xff] %v1873_v62 }
 0x2cc   :  { %v1875_v1 = vpop.f32.mrf.mxu3 }
 0x2cd   :  { %v1876_v5 = vadd.f32 %v3909_v20, %v1875_v1 }
 0x2cf   :  { %1931 = vst [vmem:[#allocation2 + $0xa0] sm:$0xff] %v1876_v5 }
 0x2d4   :  { %v1878_v24 = vpop.f32.mrf.mxu3 }
 0x2d5   :  { %v1879_v56 = vadd.f32 %v3909_v20, %v1878_v24 }
 0x2d7   :  { %1932 = vst [vmem:[#allocation2 + $0xa8] sm:$0xff] %v1879_v56 }
 0x2dc   :  { %v1881_v40 = vpop.f32.mrf.mxu3 }
 0x2dd   :  { %v1882_v11 = vadd.f32 %v3909_v20, %v1881_v40 }
 0x2df   :  { %1933 = vst [vmem:[#allocation2 + $0xb0] sm:$0xff] %v1882_v11 }
 0x2e4   :  { %v1884_v51 = vpop.f32.mrf.mxu3 }
 0x2e5   :  { %v1885_v9 = vadd.f32 %v3909_v20, %v1884_v51 }
 0x2e7   :  { %1934 = vst [vmem:[#allocation2 + $0xb8] sm:$0xff] %v1885_v9 }
 0x2ec   :  { %v1887_v10 = vpop.f32.mrf.mxu3 }
 0x2ed   :  { %v1888_v18 = vadd.f32 %v3909_v20, %v1887_v10 }
 0x2ef   :  { %1935 = vst [vmem:[#allocation2 + $0xc0] sm:$0xff] %v1888_v18 }
 0x2f4   :  { %v1890_v34 = vpop.f32.mrf.mxu3 }
 0x2f5   :  { %v1891_v23 = vadd.f32 %v3909_v20, %v1890_v34 }
 0x2f7   :  { %1936 = vst [vmem:[#allocation2 + $0xc8] sm:$0xff] %v1891_v23 }
 0x2fc   :  { %v1893_v7 = vpop.f32.mrf.mxu3 }
 0x2fd   :  { %v1894_v12 = vadd.f32 %v3909_v20, %v1893_v7 }
 0x2ff   :  { %1937 = vst [vmem:[#allocation2 + $0xd0] sm:$0xff] %v1894_v12 }
 0x304   :  { %v1896_v46 = vpop.f32.mrf.mxu3 }
 0x305   :  { %v1897_v63 = vadd.f32 %v3909_v20, %v1896_v46 }
 0x307   :  { %1938 = vst [vmem:[#allocation2 + $0xd8] sm:$0xff] %v1897_v63 }
 0x30c   :  { %v1899_v19 = vpop.f32.mrf.mxu3 }
 0x30d   :  { %v1900_v27 = vadd.f32 %v3909_v20, %v1899_v19 }
 0x30f   :  { %1939 = vst [vmem:[#allocation2 + $0xe0] sm:$0xff] %v1900_v27 }
 0x314   :  { %v1902_v60 = vpop.f32.mrf.mxu3 }
 0x315   :  { %v1903_v48 = vadd.f32 %v3909_v20, %v1902_v60 }
 0x317   :  { %1940 = vst [vmem:[#allocation2 + $0xe8] sm:$0xff] %v1903_v48 }
 0x31c   :  { %v1905_v42 = vpop.f32.mrf.mxu3 }
 0x31d   :  { %v1906_v39 = vadd.f32 %v3909_v20, %v1905_v42 }
 0x31f   :  { %1941 = vst [vmem:[#allocation2 + $0xf0] sm:$0xff] %v1906_v39 }
 0x324   :  { %v1908_v6 = vpop.f32.mrf.mxu3 }
 0x325   :  { %v1909_v21 = vadd.f32 %v3909_v20, %v1908_v6 }
 0x327   :  { %1942 = vst [vmem:[#allocation2 + $0xf8] sm:$0xff] %v1909_v21 }
 0x328   :  { %1955 = dma.vmem_to_hbm [thread:$0]  %s1948_s21, 4096, %s1950_s3, [#allocation3], %s2814_s24, %s2814_s24, %s2815_s25  }
 0x329   :  { %2811 = dma.done.wait [#allocation3], 4096  }
 0x32a   :  { %2812 = vsyncadd [#allocation3], 4294963200 }
 0x32b   :  { %1960 = vsyncpa [#allocation3], 1 }

</bundles_post_ra>
